<compile_context>
chip_gen: v6e
topology: v6e:2x2x1
jax: 0.10.0
libtpu: 0.0.40
codegen_flags: <defaults>
</compile_context>

<pallas_src>
import functools

import jax
import jax.numpy as jnp
from jax.experimental import pallas as pl
from jax.experimental.pallas import tpu as pltpu


# ----------------------------------------------------------------------------
# Pallas kernel: fused (grouped) matmul + bias + LeakyReLU for one group / tile
# ----------------------------------------------------------------------------
def gconv_lrelu_kernel(x_ref, w_ref, b_ref, o_ref, *, neg_slope, use_vpu):
    # x_ref: (R, TT)   im2col slab for this group / lane tile, R = cin_g * K  (bf16)
    # w_ref: (Cg, R)   per-group weight, contraction matches slab rows        (bf16)
    # b_ref: (Cg, 1)   per-group bias                                         (f32)
    # o_ref: (Cg, TT)  output tile                                            (f32)
    if use_vpu:
        # Tiny contraction (first layer: Cin=1, K=15): broadcast FMA on the VPU.
        # Balanced-tree accumulation exposes ILP across the 4 VALUs.
        w = w_ref[...].astype(jnp.float32)          # (Cg, R)
        x = x_ref[...].astype(jnp.float32)          # (R, TT)
        r_dim = w.shape[1]
        parts = [w[:, r : r + 1] * x[r : r + 1, :] for r in range(r_dim)]
        while len(parts) > 1:
            nxt = [parts[i] + parts[i + 1] for i in range(0, len(parts) - 1, 2)]
            if len(parts) % 2:
                nxt.append(parts[-1])
            parts = nxt
        z = parts[0] + b_ref[...]
    else:
        # Single MXU matmul with the full cin_g*K contraction; bf16 operands,
        # f32 accumulation.
        z = (
            jnp.dot(w_ref[...], x_ref[...], preferred_element_type=jnp.float32)
            + b_ref[...]
        )
    o_ref[...] = jnp.where(z >= 0.0, z, neg_slope * z).astype(o_ref.dtype)


# ----------------------------------------------------------------------------
# pallas_call wrapper: grid over (groups, lane tiles)
# ----------------------------------------------------------------------------
def grouped_matmul_lrelu(x_col, w_col, b_col, *, neg_slope=0.2, lane_tile=512):
    # x_col: (G, R, BT) bf16   im2col slabs per group
    # w_col: (G, Cg, R) bf16   per-group weights
    # b_col: (G, Cg, 1) f32    per-group bias
    G, R, BT = x_col.shape
    Cg = w_col.shape[1]

    if BT <= lane_tile:
        tt, nt, bt_pad = BT, 1, BT
    else:
        tt = lane_tile
        nt = (BT + tt - 1) // tt
        bt_pad = nt * tt
        x_col = jnp.pad(x_col, ((0, 0), (0, 0), (0, bt_pad - BT)))

    kernel = functools.partial(
        gconv_lrelu_kernel, neg_slope=neg_slope, use_vpu=(R < 32)
    )
    out = pl.pallas_call(
        kernel,
        out_shape=jax.ShapeDtypeStruct((G, Cg, bt_pad), jnp.float32),
        grid=(G, nt),
        in_specs=[
            pl.BlockSpec((None, R, tt), lambda g, t: (g, 0, t)),
            pl.BlockSpec((None, Cg, R), lambda g, t: (g, 0, 0)),
            pl.BlockSpec((None, Cg, 1), lambda g, t: (g, 0, 0)),
        ],
        out_specs=pl.BlockSpec((None, Cg, tt), lambda g, t: (g, 0, t)),
        compiler_params=pltpu.CompilerParams(
            dimension_semantics=("parallel", "parallel")
        ),
    )(x_col, w_col, b_col)
    return out[:, :, :BT] if bt_pad != BT else out


# ----------------------------------------------------------------------------
# One conv block: pad -> im2col (thin JAX glue) -> fused Pallas grouped matmul
# ----------------------------------------------------------------------------
def conv1d_lrelu_block(x_cbt, w, b, *, stride, pad, pad_mode, groups, neg_slope=0.2):
    # x_cbt: (Cin, B, T) f32 activations in (channels, batch, time) layout
    # w:     (Cout, Cin // groups, K) f32 grouped weight (torch layout)
    # b:     (Cout,) f32
    Cin, B, T = x_cbt.shape
    Cout, cin_g, K = w.shape
    assert Cin == cin_g * groups and Cout % groups == 0
    cout_g = Cout // groups

    if pad_mode == "reflect":
        xp = jnp.pad(x_cbt, ((0, 0), (0, 0), (pad, pad)), mode="reflect")
    else:
        xp = jnp.pad(x_cbt, ((0, 0), (0, 0), (pad, pad)))
    xp = xp.astype(jnp.bfloat16)  # cast before im2col: slab materializes at half bytes
    Tp = xp.shape[-1]
    Tout = (Tp - K) // stride + 1

    # im2col: taps[c, k, b, t] = xp[c, b, stride * t + k]
    taps = jnp.stack(
        [xp[:, :, k : k + stride * (Tout - 1) + 1 : stride] for k in range(K)],
        axis=1,
    )  # (Cin, K, B, Tout) bf16

    # Contraction index within a group is c_local*K + k for both slab and weight.
    x_col = taps.reshape(groups, cin_g * K, B * Tout)
    w_col = w.astype(jnp.bfloat16).reshape(groups, cout_g, cin_g * K)
    b_col = b.astype(jnp.float32).reshape(groups, cout_g, 1)

    out = grouped_matmul_lrelu(x_col, w_col, b_col, neg_slope=neg_slope)
    return out.reshape(Cout, B, Tout)


# ----------------------------------------------------------------------------
# Module construction (deterministic synthetic parameters)
# ----------------------------------------------------------------------------
def build_layer_cfgs(ndf, n_layers_d, downsamp_factor, n_speakers):
    layers = []
    in_c, out_c = 1, ndf
    layers.append(dict(in_c=in_c, out_c=out_c, k=15, stride=1, pad=7,
                       groups=1, pad_mode="reflect"))
    in_c = out_c
    stride = downsamp_factor
    for _ in range(1, n_layers_d + 1):
        out_c = min(in_c * stride, 1024)
        layers.append(dict(in_c=in_c, out_c=out_c, k=stride * 10 + 1,
                           stride=stride, pad=stride * 5,
                           groups=in_c // 4, pad_mode="zero"))
        in_c = out_c
    out_c = min(in_c * 2, 1024)
    layers.append(dict(in_c=in_c, out_c=out_c, k=5, stride=1, pad=2,
                       groups=1, pad_mode="zero"))
    in_c = out_c
    # last_layer
    layers.append(dict(in_c=in_c, out_c=n_speakers, k=3, stride=1, pad=1,
                       groups=1, pad_mode="zero"))
    return layers


def init_params(key, layer_cfgs):
    params = []
    for cfg in layer_cfgs:
        key, kw, kb = jax.random.split(key, 3)
        cin_g = cfg["in_c"] // cfg["groups"]
        fan_in = cin_g * cfg["k"]
        bound = 1.0 / (fan_in ** 0.5)
        w = jax.random.uniform(kw, (cfg["out_c"], cin_g, cfg["k"]),
                               jnp.float32, -bound, bound)
        b = jax.random.uniform(kb, (cfg["out_c"],), jnp.float32, -bound, bound)
        params.append(dict(w=w, b=b))
    return params


# ----------------------------------------------------------------------------
# Forward pass (mirrors NLayerDiscriminator.forward)
# ----------------------------------------------------------------------------
def nlayer_discriminator_forward(x, params, y=None, *, layer_cfgs):
    # x: (B, 1, T).  Internally we keep (C, B, T) so the kernel's lane axis is B*T.
    h = jnp.transpose(x, (1, 0, 2))
    results = []
    for cfg, p in zip(layer_cfgs, params):
        h = conv1d_lrelu_block(
            h, p["w"], p["b"],
            stride=cfg["stride"], pad=cfg["pad"],
            pad_mode=cfg["pad_mode"], groups=cfg["groups"],
        )
        results.append(jnp.transpose(h, (1, 0, 2)))  # (B, C, T) for API parity
    if y is not None:
        # torch.gather(x, dim=1, index=y broadcast over time).squeeze(1)
        #   -> out[b, t] = x[b, y[b], t]   (plain-JAX advanced indexing)
        last = results[-1]
        results[-1] = last[jnp.arange(last.shape[0]), y]
    return results


# ----------------------------------------------------------------------------
# Pure-JAX reference (lax.conv) for correctness validation
# ----------------------------------------------------------------------------
def reference_forward(x, params, y, *, layer_cfgs):
    h = x  # (B, C, T)
    results = []
    for cfg, p in zip(layer_cfgs, params):
        pad = cfg["pad"]
        mode = "reflect" if cfg["pad_mode"] == "reflect" else "constant"
        hp = jnp.pad(h, ((0, 0), (0, 0), (pad, pad)), mode=mode)
        z = jax.lax.conv_general_dilated(
            hp, p["w"], window_strides=(cfg["stride"],), padding="VALID",
            dimension_numbers=("NCH", "OIH", "NCH"),
            feature_group_count=cfg["groups"],
        )
        z = z + p["b"][None, :, None]
        h = jnp.where(z >= 0.0, z, 0.2 * z)
        results.append(h)
    if y is not None:
        last = results[-1]
        results[-1] = last[jnp.arange(last.shape[0]), y]
    return results


# ----------------------------------------------------------------------------
if __name__ == "__main__":
    # small synthetic config (cfg.model.* / cfg.dataset.*)
    ndf = 16
    n_layers_D = 2
    num_D = 1               # unused in forward
    downsamp_factor = 2
    n_D_updates = 1         # unused in forward
    n_speakers = 4

    B, T = 2, 64

    layer_cfgs = build_layer_cfgs(ndf, n_layers_D, downsamp_factor, n_speakers)

    key = jax.random.PRNGKey(0)
    key, kx, kp = jax.random.split(key, 3)
    params = init_params(kp, layer_cfgs)

    x = jax.random.normal(kx, (B, 1, T), jnp.float32)
    y = jnp.array([1, 3], jnp.int32)   # one speaker id per batch element

    @jax.jit
    def fwd(x_, params_, y_):
        return nlayer_discriminator_forward(x_, params_, y_, layer_cfgs=layer_cfgs)

    results = fwd(x, params, y)
    results = jax.block_until_ready(results)

    # expected shapes:
    #   (2,16,64) (2,32,32) (2,64,16) (2,128,16) and final gathered (2,16)
    assert results[0].shape == (B, ndf, T)
    assert results[1].shape == (B, 32, 32)
    assert results[2].shape == (B, 64, 16)
    assert results[3].shape == (B, 128, 16)
    assert results[4].shape == (B, 16)

    # numerical check against a pure-JAX reference (bf16 matmul operands -> loose tol)
    refs = jax.block_until_ready(
        reference_forward(x, params, y, layer_cfgs=layer_cfgs))
    for got, ref in zip(results, refs):
        assert got.shape == ref.shape
        assert jnp.allclose(got, ref, rtol=5e-2, atol=2e-2), (
            float(jnp.max(jnp.abs(got - ref))))

    print("KERNEL_OK")
</pallas_src>

<mosaic_0001>
module attributes {stable_mosaic.version = 11 : i64} {
  func.func @gconv_lrelu_kernel(%arg0: i32, %arg1: i32, %arg2: memref<1x15x128xbf16, #tpu.memory_space<vmem>>, %arg3: memref<1x16x15xbf16, #tpu.memory_space<vmem>>, %arg4: memref<1x16x1xf32, #tpu.memory_space<vmem>>, %arg5: memref<1x16x128xf32, #tpu.memory_space<vmem>>) attributes {dimension_semantics = [#tpu.dimension_semantics<parallel>, #tpu.dimension_semantics<parallel>], iteration_bounds = array<i64: 1, 1>, scalar_prefetch = 0 : i64, scratch_operands = 0 : i64, tpu.core_type = #tpu.core_type<tc>, window_params = [{transform_indices = @transform_0, window_bounds = array<i64: 1, 15, 128>}, {transform_indices = @transform_1, window_bounds = array<i64: 1, 16, 15>}, {transform_indices = @transform_2, window_bounds = array<i64: 1, 16, 1>}, {transform_indices = @transform_3, window_bounds = array<i64: 1, 16, 128>}]} {
    %c0 = arith.constant 0 : index
    %c0_0 = arith.constant 0 : index
    %c0_1 = arith.constant 0 : index
    %0 = vector.load %arg3[%c0, %c0_0, %c0_1] : memref<1x16x15xbf16, #tpu.memory_space<vmem>>, vector<1x16x15xbf16>
    %1 = vector.shape_cast %0 : vector<1x16x15xbf16> to vector<16x15xbf16>
    %2 = arith.extf %1 : vector<16x15xbf16> to vector<16x15xf32>
    %c0_2 = arith.constant 0 : index
    %c0_3 = arith.constant 0 : index
    %c0_4 = arith.constant 0 : index
    %3 = vector.load %arg2[%c0_2, %c0_3, %c0_4] : memref<1x15x128xbf16, #tpu.memory_space<vmem>>, vector<1x15x128xbf16>
    %4 = vector.shape_cast %3 : vector<1x15x128xbf16> to vector<15x128xbf16>
    %5 = arith.extf %4 : vector<15x128xbf16> to vector<15x128xf32>
    %6 = vector.extract_strided_slice %2 {offsets = [0, 0], sizes = [16, 1], strides = [1, 1]} : vector<16x15xf32> to vector<16x1xf32>
    %7 = vector.extract_strided_slice %5 {offsets = [0, 0], sizes = [1, 128], strides = [1, 1]} : vector<15x128xf32> to vector<1x128xf32>
    %8 = vector.broadcast %6 : vector<16x1xf32> to vector<16x128xf32>
    %9 = vector.broadcast %7 : vector<1x128xf32> to vector<16x128xf32>
    %10 = arith.mulf %8, %9 : vector<16x128xf32>
    %11 = vector.extract_strided_slice %2 {offsets = [0, 1], sizes = [16, 1], strides = [1, 1]} : vector<16x15xf32> to vector<16x1xf32>
    %12 = vector.extract_strided_slice %5 {offsets = [1, 0], sizes = [1, 128], strides = [1, 1]} : vector<15x128xf32> to vector<1x128xf32>
    %13 = vector.broadcast %11 : vector<16x1xf32> to vector<16x128xf32>
    %14 = vector.broadcast %12 : vector<1x128xf32> to vector<16x128xf32>
    %15 = arith.mulf %13, %14 : vector<16x128xf32>
    %16 = vector.extract_strided_slice %2 {offsets = [0, 2], sizes = [16, 1], strides = [1, 1]} : vector<16x15xf32> to vector<16x1xf32>
    %17 = vector.extract_strided_slice %5 {offsets = [2, 0], sizes = [1, 128], strides = [1, 1]} : vector<15x128xf32> to vector<1x128xf32>
    %18 = vector.broadcast %16 : vector<16x1xf32> to vector<16x128xf32>
    %19 = vector.broadcast %17 : vector<1x128xf32> to vector<16x128xf32>
    %20 = arith.mulf %18, %19 : vector<16x128xf32>
    %21 = vector.extract_strided_slice %2 {offsets = [0, 3], sizes = [16, 1], strides = [1, 1]} : vector<16x15xf32> to vector<16x1xf32>
    %22 = vector.extract_strided_slice %5 {offsets = [3, 0], sizes = [1, 128], strides = [1, 1]} : vector<15x128xf32> to vector<1x128xf32>
    %23 = vector.broadcast %21 : vector<16x1xf32> to vector<16x128xf32>
    %24 = vector.broadcast %22 : vector<1x128xf32> to vector<16x128xf32>
    %25 = arith.mulf %23, %24 : vector<16x128xf32>
    %26 = vector.extract_strided_slice %2 {offsets = [0, 4], sizes = [16, 1], strides = [1, 1]} : vector<16x15xf32> to vector<16x1xf32>
    %27 = vector.extract_strided_slice %5 {offsets = [4, 0], sizes = [1, 128], strides = [1, 1]} : vector<15x128xf32> to vector<1x128xf32>
    %28 = vector.broadcast %26 : vector<16x1xf32> to vector<16x128xf32>
    %29 = vector.broadcast %27 : vector<1x128xf32> to vector<16x128xf32>
    %30 = arith.mulf %28, %29 : vector<16x128xf32>
    %31 = vector.extract_strided_slice %2 {offsets = [0, 5], sizes = [16, 1], strides = [1, 1]} : vector<16x15xf32> to vector<16x1xf32>
    %32 = vector.extract_strided_slice %5 {offsets = [5, 0], sizes = [1, 128], strides = [1, 1]} : vector<15x128xf32> to vector<1x128xf32>
    %33 = vector.broadcast %31 : vector<16x1xf32> to vector<16x128xf32>
    %34 = vector.broadcast %32 : vector<1x128xf32> to vector<16x128xf32>
    %35 = arith.mulf %33, %34 : vector<16x128xf32>
    %36 = vector.extract_strided_slice %2 {offsets = [0, 6], sizes = [16, 1], strides = [1, 1]} : vector<16x15xf32> to vector<16x1xf32>
    %37 = vector.extract_strided_slice %5 {offsets = [6, 0], sizes = [1, 128], strides = [1, 1]} : vector<15x128xf32> to vector<1x128xf32>
    %38 = vector.broadcast %36 : vector<16x1xf32> to vector<16x128xf32>
    %39 = vector.broadcast %37 : vector<1x128xf32> to vector<16x128xf32>
    %40 = arith.mulf %38, %39 : vector<16x128xf32>
    %41 = vector.extract_strided_slice %2 {offsets = [0, 7], sizes = [16, 1], strides = [1, 1]} : vector<16x15xf32> to vector<16x1xf32>
    %42 = vector.extract_strided_slice %5 {offsets = [7, 0], sizes = [1, 128], strides = [1, 1]} : vector<15x128xf32> to vector<1x128xf32>
    %43 = vector.broadcast %41 : vector<16x1xf32> to vector<16x128xf32>
    %44 = vector.broadcast %42 : vector<1x128xf32> to vector<16x128xf32>
    %45 = arith.mulf %43, %44 : vector<16x128xf32>
    %46 = vector.extract_strided_slice %2 {offsets = [0, 8], sizes = [16, 1], strides = [1, 1]} : vector<16x15xf32> to vector<16x1xf32>
    %47 = vector.extract_strided_slice %5 {offsets = [8, 0], sizes = [1, 128], strides = [1, 1]} : vector<15x128xf32> to vector<1x128xf32>
    %48 = vector.broadcast %46 : vector<16x1xf32> to vector<16x128xf32>
    %49 = vector.broadcast %47 : vector<1x128xf32> to vector<16x128xf32>
    %50 = arith.mulf %48, %49 : vector<16x128xf32>
    %51 = vector.extract_strided_slice %2 {offsets = [0, 9], sizes = [16, 1], strides = [1, 1]} : vector<16x15xf32> to vector<16x1xf32>
    %52 = vector.extract_strided_slice %5 {offsets = [9, 0], sizes = [1, 128], strides = [1, 1]} : vector<15x128xf32> to vector<1x128xf32>
    %53 = vector.broadcast %51 : vector<16x1xf32> to vector<16x128xf32>
    %54 = vector.broadcast %52 : vector<1x128xf32> to vector<16x128xf32>
    %55 = arith.mulf %53, %54 : vector<16x128xf32>
    %56 = vector.extract_strided_slice %2 {offsets = [0, 10], sizes = [16, 1], strides = [1, 1]} : vector<16x15xf32> to vector<16x1xf32>
    %57 = vector.extract_strided_slice %5 {offsets = [10, 0], sizes = [1, 128], strides = [1, 1]} : vector<15x128xf32> to vector<1x128xf32>
    %58 = vector.broadcast %56 : vector<16x1xf32> to vector<16x128xf32>
    %59 = vector.broadcast %57 : vector<1x128xf32> to vector<16x128xf32>
    %60 = arith.mulf %58, %59 : vector<16x128xf32>
    %61 = vector.extract_strided_slice %2 {offsets = [0, 11], sizes = [16, 1], strides = [1, 1]} : vector<16x15xf32> to vector<16x1xf32>
    %62 = vector.extract_strided_slice %5 {offsets = [11, 0], sizes = [1, 128], strides = [1, 1]} : vector<15x128xf32> to vector<1x128xf32>
    %63 = vector.broadcast %61 : vector<16x1xf32> to vector<16x128xf32>
    %64 = vector.broadcast %62 : vector<1x128xf32> to vector<16x128xf32>
    %65 = arith.mulf %63, %64 : vector<16x128xf32>
    %66 = vector.extract_strided_slice %2 {offsets = [0, 12], sizes = [16, 1], strides = [1, 1]} : vector<16x15xf32> to vector<16x1xf32>
    %67 = vector.extract_strided_slice %5 {offsets = [12, 0], sizes = [1, 128], strides = [1, 1]} : vector<15x128xf32> to vector<1x128xf32>
    %68 = vector.broadcast %66 : vector<16x1xf32> to vector<16x128xf32>
    %69 = vector.broadcast %67 : vector<1x128xf32> to vector<16x128xf32>
    %70 = arith.mulf %68, %69 : vector<16x128xf32>
    %71 = vector.extract_strided_slice %2 {offsets = [0, 13], sizes = [16, 1], strides = [1, 1]} : vector<16x15xf32> to vector<16x1xf32>
    %72 = vector.extract_strided_slice %5 {offsets = [13, 0], sizes = [1, 128], strides = [1, 1]} : vector<15x128xf32> to vector<1x128xf32>
    %73 = vector.broadcast %71 : vector<16x1xf32> to vector<16x128xf32>
    %74 = vector.broadcast %72 : vector<1x128xf32> to vector<16x128xf32>
    %75 = arith.mulf %73, %74 : vector<16x128xf32>
    %76 = vector.extract_strided_slice %2 {offsets = [0, 14], sizes = [16, 1], strides = [1, 1]} : vector<16x15xf32> to vector<16x1xf32>
    %77 = vector.extract_strided_slice %5 {offsets = [14, 0], sizes = [1, 128], strides = [1, 1]} : vector<15x128xf32> to vector<1x128xf32>
    %78 = vector.broadcast %76 : vector<16x1xf32> to vector<16x128xf32>
    %79 = vector.broadcast %77 : vector<1x128xf32> to vector<16x128xf32>
    %80 = arith.mulf %78, %79 : vector<16x128xf32>
    %81 = arith.addf %10, %15 : vector<16x128xf32>
    %82 = arith.addf %20, %25 : vector<16x128xf32>
    %83 = arith.addf %30, %35 : vector<16x128xf32>
    %84 = arith.addf %40, %45 : vector<16x128xf32>
    %85 = arith.addf %50, %55 : vector<16x128xf32>
    %86 = arith.addf %60, %65 : vector<16x128xf32>
    %87 = arith.addf %70, %75 : vector<16x128xf32>
    %88 = arith.addf %81, %82 : vector<16x128xf32>
    %89 = arith.addf %83, %84 : vector<16x128xf32>
    %90 = arith.addf %85, %86 : vector<16x128xf32>
    %91 = arith.addf %87, %80 : vector<16x128xf32>
    %92 = arith.addf %88, %89 : vector<16x128xf32>
    %93 = arith.addf %90, %91 : vector<16x128xf32>
    %94 = arith.addf %92, %93 : vector<16x128xf32>
    %c0_5 = arith.constant 0 : index
    %c0_6 = arith.constant 0 : index
    %c0_7 = arith.constant 0 : index
    %95 = vector.load %arg4[%c0_5, %c0_6, %c0_7] : memref<1x16x1xf32, #tpu.memory_space<vmem>>, vector<1x16x1xf32>
    %96 = vector.shape_cast %95 : vector<1x16x1xf32> to vector<16x1xf32>
    %97 = vector.broadcast %96 : vector<16x1xf32> to vector<16x128xf32>
    %98 = arith.addf %94, %97 : vector<16x128xf32>
    %cst = arith.constant 0.000000e+00 : f32
    %99 = vector.broadcast %cst : f32 to vector<16x128xf32>
    %100 = arith.cmpf oge, %98, %99 : vector<16x128xf32>
    %cst_8 = arith.constant 2.000000e-01 : f32
    %101 = vector.broadcast %cst_8 : f32 to vector<16x128xf32>
    %102 = arith.mulf %101, %98 : vector<16x128xf32>
    %103 = arith.select %100, %98, %102 : vector<16x128xi1>, vector<16x128xf32>
    %c0_9 = arith.constant 0 : index
    %c0_10 = arith.constant 0 : index
    %c0_11 = arith.constant 0 : index
    %104 = vector.load %arg5[%c0_9, %c0_10, %c0_11] : memref<1x16x128xf32, #tpu.memory_space<vmem>>, vector<1x16x128xf32>
    %105 = vector.shape_cast %104 : vector<1x16x128xf32> to vector<16x128xf32>
    %106 = vector.shape_cast %103 : vector<16x128xf32> to vector<1x16x128xf32>
    tpu.vector_store %arg5[%c0_9, %c0_10, %c0_11], %106 {strides = array<i32>} : memref<1x16x128xf32, #tpu.memory_space<vmem>>, vector<1x16x128xf32>,
    return
  }
  func.func @transform_0(%arg0: i32, %arg1: i32) -> (i32, i32, i32) {
    %c0_i32 = arith.constant 0 : i32
    %c0_i32_0 = arith.constant 0 : i32
    return %arg0, %c0_i32, %arg1 : i32, i32, i32
  }
  func.func @transform_1(%arg0: i32, %arg1: i32) -> (i32, i32, i32) {
    %c0_i32 = arith.constant 0 : i32
    %c0_i32_0 = arith.constant 0 : i32
    %c0_i32_1 = arith.constant 0 : i32
    return %arg0, %c0_i32, %c0_i32_0 : i32, i32, i32
  }
  func.func @transform_2(%arg0: i32, %arg1: i32) -> (i32, i32, i32) {
    %c0_i32 = arith.constant 0 : i32
    %c0_i32_0 = arith.constant 0 : i32
    %c0_i32_1 = arith.constant 0 : i32
    return %arg0, %c0_i32, %c0_i32_0 : i32, i32, i32
  }
  func.func @transform_3(%arg0: i32, %arg1: i32) -> (i32, i32, i32) {
    %c0_i32 = arith.constant 0 : i32
    %c0_i32_0 = arith.constant 0 : i32
    return %arg0, %c0_i32, %arg1 : i32, i32, i32
  }
}

module attributes {stable_mosaic.version = 11 : i64} {
  func.func @gconv_lrelu_kernel(%arg0: i32, %arg1: i32, %arg2: memref<1x84x64xbf16, #tpu.memory_space<vmem>>, %arg3: memref<1x8x84xbf16, #tpu.memory_space<vmem>>, %arg4: memref<1x8x1xf32, #tpu.memory_space<vmem>>, %arg5: memref<1x8x64xf32, #tpu.memory_space<vmem>>) attributes {dimension_semantics = [#tpu.dimension_semantics<parallel>, #tpu.dimension_semantics<parallel>], iteration_bounds = array<i64: 4, 1>, scalar_prefetch = 0 : i64, scratch_operands = 0 : i64, tpu.core_type = #tpu.core_type<tc>, window_params = [{transform_indices = @transform_0, window_bounds = array<i64: 1, 84, 64>}, {transform_indices = @transform_1, window_bounds = array<i64: 1, 8, 84>}, {transform_indices = @transform_2, window_bounds = array<i64: 1, 8, 1>}, {transform_indices = @transform_3, window_bounds = array<i64: 1, 8, 64>}]} {
    %c0 = arith.constant 0 : index
    %c0_0 = arith.constant 0 : index
    %c0_1 = arith.constant 0 : index
    %0 = vector.load %arg3[%c0, %c0_0, %c0_1] : memref<1x8x84xbf16, #tpu.memory_space<vmem>>, vector<1x8x84xbf16>
    %1 = vector.shape_cast %0 : vector<1x8x84xbf16> to vector<8x84xbf16>
    %c0_2 = arith.constant 0 : index
    %c0_3 = arith.constant 0 : index
    %c0_4 = arith.constant 0 : index
    %2 = vector.load %arg2[%c0_2, %c0_3, %c0_4] : memref<1x84x64xbf16, #tpu.memory_space<vmem>>, vector<1x84x64xbf16>
    %3 = vector.shape_cast %2 : vector<1x84x64xbf16> to vector<84x64xbf16>
    %cst = arith.constant dense<0.000000e+00> : vector<8x64xf32>
    %4 = tpu.matmul %1, %3, %cst {dimension_numbers = #tpu.dot_dimension_numbers<[1], [0], [0], [1], [0, 0, 1, 1], [], []>} : vector<8x84xbf16>, vector<84x64xbf16>, vector<8x64xf32> -> vector<8x64xf32>
    %c0_5 = arith.constant 0 : index
    %c0_6 = arith.constant 0 : index
    %c0_7 = arith.constant 0 : index
    %5 = vector.load %arg4[%c0_5, %c0_6, %c0_7] : memref<1x8x1xf32, #tpu.memory_space<vmem>>, vector<1x8x1xf32>
    %6 = vector.shape_cast %5 : vector<1x8x1xf32> to vector<8x1xf32>
    %7 = vector.broadcast %6 : vector<8x1xf32> to vector<8x64xf32>
    %8 = arith.addf %4, %7 : vector<8x64xf32>
    %cst_8 = arith.constant 0.000000e+00 : f32
    %9 = vector.broadcast %cst_8 : f32 to vector<8x64xf32>
    %10 = arith.cmpf oge, %8, %9 : vector<8x64xf32>
    %cst_9 = arith.constant 2.000000e-01 : f32
    %11 = vector.broadcast %cst_9 : f32 to vector<8x64xf32>
    %12 = arith.mulf %11, %8 : vector<8x64xf32>
    %13 = arith.select %10, %8, %12 : vector<8x64xi1>, vector<8x64xf32>
    %c0_10 = arith.constant 0 : index
    %c0_11 = arith.constant 0 : index
    %c0_12 = arith.constant 0 : index
    %14 = vector.load %arg5[%c0_10, %c0_11, %c0_12] : memref<1x8x64xf32, #tpu.memory_space<vmem>>, vector<1x8x64xf32>
    %15 = vector.shape_cast %14 : vector<1x8x64xf32> to vector<8x64xf32>
    %16 = vector.shape_cast %13 : vector<8x64xf32> to vector<1x8x64xf32>
    tpu.vector_store %arg5[%c0_10, %c0_11, %c0_12], %16 {strides = array<i32>} : memref<1x8x64xf32, #tpu.memory_space<vmem>>, vector<1x8x64xf32>,
    return
  }
  func.func @transform_0(%arg0: i32, %arg1: i32) -> (i32, i32, i32) {
    %c0_i32 = arith.constant 0 : i32
    %c0_i32_0 = arith.constant 0 : i32
    return %arg0, %c0_i32, %arg1 : i32, i32, i32
  }
  func.func @transform_1(%arg0: i32, %arg1: i32) -> (i32, i32, i32) {
    %c0_i32 = arith.constant 0 : i32
    %c0_i32_0 = arith.constant 0 : i32
    %c0_i32_1 = arith.constant 0 : i32
    return %arg0, %c0_i32, %c0_i32_0 : i32, i32, i32
  }
  func.func @transform_2(%arg0: i32, %arg1: i32) -> (i32, i32, i32) {
    %c0_i32 = arith.constant 0 : i32
    %c0_i32_0 = arith.constant 0 : i32
    %c0_i32_1 = arith.constant 0 : i32
    return %arg0, %c0_i32, %c0_i32_0 : i32, i32, i32
  }
  func.func @transform_3(%arg0: i32, %arg1: i32) -> (i32, i32, i32) {
    %c0_i32 = arith.constant 0 : i32
    %c0_i32_0 = arith.constant 0 : i32
    return %arg0, %c0_i32, %arg1 : i32, i32, i32
  }
}

module attributes {stable_mosaic.version = 11 : i64} {
  func.func @gconv_lrelu_kernel(%arg0: i32, %arg1: i32, %arg2: memref<1x84x32xbf16, #tpu.memory_space<vmem>>, %arg3: memref<1x8x84xbf16, #tpu.memory_space<vmem>>, %arg4: memref<1x8x1xf32, #tpu.memory_space<vmem>>, %arg5: memref<1x8x32xf32, #tpu.memory_space<vmem>>) attributes {dimension_semantics = [#tpu.dimension_semantics<parallel>, #tpu.dimension_semantics<parallel>], iteration_bounds = array<i64: 8, 1>, scalar_prefetch = 0 : i64, scratch_operands = 0 : i64, tpu.core_type = #tpu.core_type<tc>, window_params = [{transform_indices = @transform_0, window_bounds = array<i64: 1, 84, 32>}, {transform_indices = @transform_1, window_bounds = array<i64: 1, 8, 84>}, {transform_indices = @transform_2, window_bounds = array<i64: 1, 8, 1>}, {transform_indices = @transform_3, window_bounds = array<i64: 1, 8, 32>}]} {
    %c0 = arith.constant 0 : index
    %c0_0 = arith.constant 0 : index
    %c0_1 = arith.constant 0 : index
    %0 = vector.load %arg3[%c0, %c0_0, %c0_1] : memref<1x8x84xbf16, #tpu.memory_space<vmem>>, vector<1x8x84xbf16>
    %1 = vector.shape_cast %0 : vector<1x8x84xbf16> to vector<8x84xbf16>
    %c0_2 = arith.constant 0 : index
    %c0_3 = arith.constant 0 : index
    %c0_4 = arith.constant 0 : index
    %2 = vector.load %arg2[%c0_2, %c0_3, %c0_4] : memref<1x84x32xbf16, #tpu.memory_space<vmem>>, vector<1x84x32xbf16>
    %3 = vector.shape_cast %2 : vector<1x84x32xbf16> to vector<84x32xbf16>
    %cst = arith.constant dense<0.000000e+00> : vector<8x32xf32>
    %4 = tpu.matmul %1, %3, %cst {dimension_numbers = #tpu.dot_dimension_numbers<[1], [0], [0], [1], [0, 0, 1, 1], [], []>} : vector<8x84xbf16>, vector<84x32xbf16>, vector<8x32xf32> -> vector<8x32xf32>
    %c0_5 = arith.constant 0 : index
    %c0_6 = arith.constant 0 : index
    %c0_7 = arith.constant 0 : index
    %5 = vector.load %arg4[%c0_5, %c0_6, %c0_7] : memref<1x8x1xf32, #tpu.memory_space<vmem>>, vector<1x8x1xf32>
    %6 = vector.shape_cast %5 : vector<1x8x1xf32> to vector<8x1xf32>
    %7 = vector.broadcast %6 : vector<8x1xf32> to vector<8x32xf32>
    %8 = arith.addf %4, %7 : vector<8x32xf32>
    %cst_8 = arith.constant 0.000000e+00 : f32
    %9 = vector.broadcast %cst_8 : f32 to vector<8x32xf32>
    %10 = arith.cmpf oge, %8, %9 : vector<8x32xf32>
    %cst_9 = arith.constant 2.000000e-01 : f32
    %11 = vector.broadcast %cst_9 : f32 to vector<8x32xf32>
    %12 = arith.mulf %11, %8 : vector<8x32xf32>
    %13 = arith.select %10, %8, %12 : vector<8x32xi1>, vector<8x32xf32>
    %c0_10 = arith.constant 0 : index
    %c0_11 = arith.constant 0 : index
    %c0_12 = arith.constant 0 : index
    %14 = vector.load %arg5[%c0_10, %c0_11, %c0_12] : memref<1x8x32xf32, #tpu.memory_space<vmem>>, vector<1x8x32xf32>
    %15 = vector.shape_cast %14 : vector<1x8x32xf32> to vector<8x32xf32>
    %16 = vector.shape_cast %13 : vector<8x32xf32> to vector<1x8x32xf32>
    tpu.vector_store %arg5[%c0_10, %c0_11, %c0_12], %16 {strides = array<i32>} : memref<1x8x32xf32, #tpu.memory_space<vmem>>, vector<1x8x32xf32>,
    return
  }
  func.func @transform_0(%arg0: i32, %arg1: i32) -> (i32, i32, i32) {
    %c0_i32 = arith.constant 0 : i32
    %c0_i32_0 = arith.constant 0 : i32
    return %arg0, %c0_i32, %arg1 : i32, i32, i32
  }
  func.func @transform_1(%arg0: i32, %arg1: i32) -> (i32, i32, i32) {
    %c0_i32 = arith.constant 0 : i32
    %c0_i32_0 = arith.constant 0 : i32
    %c0_i32_1 = arith.constant 0 : i32
    return %arg0, %c0_i32, %c0_i32_0 : i32, i32, i32
  }
  func.func @transform_2(%arg0: i32, %arg1: i32) -> (i32, i32, i32) {
    %c0_i32 = arith.constant 0 : i32
    %c0_i32_0 = arith.constant 0 : i32
    %c0_i32_1 = arith.constant 0 : i32
    return %arg0, %c0_i32, %c0_i32_0 : i32, i32, i32
  }
  func.func @transform_3(%arg0: i32, %arg1: i32) -> (i32, i32, i32) {
    %c0_i32 = arith.constant 0 : i32
    %c0_i32_0 = arith.constant 0 : i32
    return %arg0, %c0_i32, %arg1 : i32, i32, i32
  }
}

module attributes {stable_mosaic.version = 11 : i64} {
  func.func @gconv_lrelu_kernel(%arg0: i32, %arg1: i32, %arg2: memref<1x320x32xbf16, #tpu.memory_space<vmem>>, %arg3: memref<1x128x320xbf16, #tpu.memory_space<vmem>>, %arg4: memref<1x128x1xf32, #tpu.memory_space<vmem>>, %arg5: memref<1x128x32xf32, #tpu.memory_space<vmem>>) attributes {dimension_semantics = [#tpu.dimension_semantics<parallel>, #tpu.dimension_semantics<parallel>], iteration_bounds = array<i64: 1, 1>, scalar_prefetch = 0 : i64, scratch_operands = 0 : i64, tpu.core_type = #tpu.core_type<tc>, window_params = [{transform_indices = @transform_0, window_bounds = array<i64: 1, 320, 32>}, {transform_indices = @transform_1, window_bounds = array<i64: 1, 128, 320>}, {transform_indices = @transform_2, window_bounds = array<i64: 1, 128, 1>}, {transform_indices = @transform_3, window_bounds = array<i64: 1, 128, 32>}]} {
    %c0 = arith.constant 0 : index
    %c0_0 = arith.constant 0 : index
    %c0_1 = arith.constant 0 : index
    %0 = vector.load %arg3[%c0, %c0_0, %c0_1] : memref<1x128x320xbf16, #tpu.memory_space<vmem>>, vector<1x128x320xbf16>
    %1 = vector.shape_cast %0 : vector<1x128x320xbf16> to vector<128x320xbf16>
    %c0_2 = arith.constant 0 : index
    %c0_3 = arith.constant 0 : index
    %c0_4 = arith.constant 0 : index
    %2 = vector.load %arg2[%c0_2, %c0_3, %c0_4] : memref<1x320x32xbf16, #tpu.memory_space<vmem>>, vector<1x320x32xbf16>
    %3 = vector.shape_cast %2 : vector<1x320x32xbf16> to vector<320x32xbf16>
    %cst = arith.constant dense<0.000000e+00> : vector<128x32xf32>
    %4 = tpu.matmul %1, %3, %cst {dimension_numbers = #tpu.dot_dimension_numbers<[1], [0], [0], [1], [0, 0, 1, 1], [], []>} : vector<128x320xbf16>, vector<320x32xbf16>, vector<128x32xf32> -> vector<128x32xf32>
    %c0_5 = arith.constant 0 : index
    %c0_6 = arith.constant 0 : index
    %c0_7 = arith.constant 0 : index
    %5 = vector.load %arg4[%c0_5, %c0_6, %c0_7] : memref<1x128x1xf32, #tpu.memory_space<vmem>>, vector<1x128x1xf32>
    %6 = vector.shape_cast %5 : vector<1x128x1xf32> to vector<128x1xf32>
    %7 = vector.broadcast %6 : vector<128x1xf32> to vector<128x32xf32>
    %8 = arith.addf %4, %7 : vector<128x32xf32>
    %cst_8 = arith.constant 0.000000e+00 : f32
    %9 = vector.broadcast %cst_8 : f32 to vector<128x32xf32>
    %10 = arith.cmpf oge, %8, %9 : vector<128x32xf32>
    %cst_9 = arith.constant 2.000000e-01 : f32
    %11 = vector.broadcast %cst_9 : f32 to vector<128x32xf32>
    %12 = arith.mulf %11, %8 : vector<128x32xf32>
    %13 = arith.select %10, %8, %12 : vector<128x32xi1>, vector<128x32xf32>
    %c0_10 = arith.constant 0 : index
    %c0_11 = arith.constant 0 : index
    %c0_12 = arith.constant 0 : index
    %14 = vector.load %arg5[%c0_10, %c0_11, %c0_12] : memref<1x128x32xf32, #tpu.memory_space<vmem>>, vector<1x128x32xf32>
    %15 = vector.shape_cast %14 : vector<1x128x32xf32> to vector<128x32xf32>
    %16 = vector.shape_cast %13 : vector<128x32xf32> to vector<1x128x32xf32>
    tpu.vector_store %arg5[%c0_10, %c0_11, %c0_12], %16 {strides = array<i32>} : memref<1x128x32xf32, #tpu.memory_space<vmem>>, vector<1x128x32xf32>,
    return
  }
  func.func @transform_0(%arg0: i32, %arg1: i32) -> (i32, i32, i32) {
    %c0_i32 = arith.constant 0 : i32
    %c0_i32_0 = arith.constant 0 : i32
    return %arg0, %c0_i32, %arg1 : i32, i32, i32
  }
  func.func @transform_1(%arg0: i32, %arg1: i32) -> (i32, i32, i32) {
    %c0_i32 = arith.constant 0 : i32
    %c0_i32_0 = arith.constant 0 : i32
    %c0_i32_1 = arith.constant 0 : i32
    return %arg0, %c0_i32, %c0_i32_0 : i32, i32, i32
  }
  func.func @transform_2(%arg0: i32, %arg1: i32) -> (i32, i32, i32) {
    %c0_i32 = arith.constant 0 : i32
    %c0_i32_0 = arith.constant 0 : i32
    %c0_i32_1 = arith.constant 0 : i32
    return %arg0, %c0_i32, %c0_i32_0 : i32, i32, i32
  }
  func.func @transform_3(%arg0: i32, %arg1: i32) -> (i32, i32, i32) {
    %c0_i32 = arith.constant 0 : i32
    %c0_i32_0 = arith.constant 0 : i32
    return %arg0, %c0_i32, %arg1 : i32, i32, i32
  }
}

module attributes {stable_mosaic.version = 11 : i64} {
  func.func @gconv_lrelu_kernel(%arg0: i32, %arg1: i32, %arg2: memref<1x384x32xbf16, #tpu.memory_space<vmem>>, %arg3: memref<1x4x384xbf16, #tpu.memory_space<vmem>>, %arg4: memref<1x4x1xf32, #tpu.memory_space<vmem>>, %arg5: memref<1x4x32xf32, #tpu.memory_space<vmem>>) attributes {dimension_semantics = [#tpu.dimension_semantics<parallel>, #tpu.dimension_semantics<parallel>], iteration_bounds = array<i64: 1, 1>, scalar_prefetch = 0 : i64, scratch_operands = 0 : i64, tpu.core_type = #tpu.core_type<tc>, window_params = [{transform_indices = @transform_0, window_bounds = array<i64: 1, 384, 32>}, {transform_indices = @transform_1, window_bounds = array<i64: 1, 4, 384>}, {transform_indices = @transform_2, window_bounds = array<i64: 1, 4, 1>}, {transform_indices = @transform_3, window_bounds = array<i64: 1, 4, 32>}]} {
    %c0 = arith.constant 0 : index
    %c0_0 = arith.constant 0 : index
    %c0_1 = arith.constant 0 : index
    %0 = vector.load %arg3[%c0, %c0_0, %c0_1] : memref<1x4x384xbf16, #tpu.memory_space<vmem>>, vector<1x4x384xbf16>
    %1 = vector.shape_cast %0 : vector<1x4x384xbf16> to vector<4x384xbf16>
    %c0_2 = arith.constant 0 : index
    %c0_3 = arith.constant 0 : index
    %c0_4 = arith.constant 0 : index
    %2 = vector.load %arg2[%c0_2, %c0_3, %c0_4] : memref<1x384x32xbf16, #tpu.memory_space<vmem>>, vector<1x384x32xbf16>
    %3 = vector.shape_cast %2 : vector<1x384x32xbf16> to vector<384x32xbf16>
    %cst = arith.constant dense<0.000000e+00> : vector<4x32xf32>
    %4 = tpu.matmul %1, %3, %cst {dimension_numbers = #tpu.dot_dimension_numbers<[1], [0], [0], [1], [0, 0, 1, 1], [], []>} : vector<4x384xbf16>, vector<384x32xbf16>, vector<4x32xf32> -> vector<4x32xf32>
    %c0_5 = arith.constant 0 : index
    %c0_6 = arith.constant 0 : index
    %c0_7 = arith.constant 0 : index
    %5 = vector.load %arg4[%c0_5, %c0_6, %c0_7] : memref<1x4x1xf32, #tpu.memory_space<vmem>>, vector<1x4x1xf32>
    %6 = vector.shape_cast %5 : vector<1x4x1xf32> to vector<4x1xf32>
    %7 = vector.broadcast %6 : vector<4x1xf32> to vector<4x32xf32>
    %8 = arith.addf %4, %7 : vector<4x32xf32>
    %cst_8 = arith.constant 0.000000e+00 : f32
    %9 = vector.broadcast %cst_8 : f32 to vector<4x32xf32>
    %10 = arith.cmpf oge, %8, %9 : vector<4x32xf32>
    %cst_9 = arith.constant 2.000000e-01 : f32
    %11 = vector.broadcast %cst_9 : f32 to vector<4x32xf32>
    %12 = arith.mulf %11, %8 : vector<4x32xf32>
    %13 = arith.select %10, %8, %12 : vector<4x32xi1>, vector<4x32xf32>
    %c0_10 = arith.constant 0 : index
    %c0_11 = arith.constant 0 : index
    %c0_12 = arith.constant 0 : index
    %14 = vector.load %arg5[%c0_10, %c0_11, %c0_12] : memref<1x4x32xf32, #tpu.memory_space<vmem>>, vector<1x4x32xf32>
    %15 = vector.shape_cast %14 : vector<1x4x32xf32> to vector<4x32xf32>
    %16 = vector.shape_cast %13 : vector<4x32xf32> to vector<1x4x32xf32>
    tpu.vector_store %arg5[%c0_10, %c0_11, %c0_12], %16 {strides = array<i32>} : memref<1x4x32xf32, #tpu.memory_space<vmem>>, vector<1x4x32xf32>,
    return
  }
  func.func @transform_0(%arg0: i32, %arg1: i32) -> (i32, i32, i32) {
    %c0_i32 = arith.constant 0 : i32
    %c0_i32_0 = arith.constant 0 : i32
    return %arg0, %c0_i32, %arg1 : i32, i32, i32
  }
  func.func @transform_1(%arg0: i32, %arg1: i32) -> (i32, i32, i32) {
    %c0_i32 = arith.constant 0 : i32
    %c0_i32_0 = arith.constant 0 : i32
    %c0_i32_1 = arith.constant 0 : i32
    return %arg0, %c0_i32, %c0_i32_0 : i32, i32, i32
  }
  func.func @transform_2(%arg0: i32, %arg1: i32) -> (i32, i32, i32) {
    %c0_i32 = arith.constant 0 : i32
    %c0_i32_0 = arith.constant 0 : i32
    %c0_i32_1 = arith.constant 0 : i32
    return %arg0, %c0_i32, %c0_i32_0 : i32, i32, i32
  }
  func.func @transform_3(%arg0: i32, %arg1: i32) -> (i32, i32, i32) {
    %c0_i32 = arith.constant 0 : i32
    %c0_i32_0 = arith.constant 0 : i32
    return %arg0, %c0_i32, %arg1 : i32, i32, i32
  }
}

</mosaic_0001>

<bundles_post_ra>
// kernel: fwd.5
= control target key start
LH: loop header
LB: loop body
LE: loop exit
PB: predicated region body
PF: predicated region fallthrough
CT: control target
= control target key end

     0   :  { %v403_v0 = vmov 2   ;;  %v404_v1 = vmov 0   ;;  %v405_v6 = vmov 3   ;;  %v406_v7 = vmov 1   ;;  %s484_s1 = inlined_call_operand.vmem [shape: bf16[1,16,15], index: 1, kind: input, shape index: {}]   ;;  %s485_s2 = inlined_call_operand.vmem [shape: f32[1,16,1], index: 2, kind: input, shape index: {}]   ;;  %s486_s0 = inlined_call_operand.vmem [shape: bf16[1,15,128], index: 0, kind: input, shape index: {}]   ;;  %s487_s3 = inlined_call_operand.vmem [shape: f32[1,16,128], index: 3, kind: output, shape index: {}]  }
   0x1   :  { %323 = vset.pattern.permute.xlu1 %v403_v0  ;;  %311 = vset.pattern.permute.xlu0 %v404_v1  ;;  %v289_v2 = vld [vmem:[%s484_s1] sm:$0xff]   ;;  %v407_v8 = vmov 4   ;;  %v408_v9 = vmov 5   ;;  %v409_v10 = vmov 6   ;;  %v410_v11 = vmov 8   ;;  %v263_v20 = vld [vmem:[%s485_s2 + $0x8] sm:$0xff] }
   0x2   :  { %v290_v3 = vunpack.c.l.bf16 %v289_v2  ;;  %v291_v4 = vunpack.c.h.bf16 %v289_v2  ;;  %v411_v12 = vmov 7   ;;  %v412_v13 = vmov 11   ;;  %v262_v19 = vld [vmem:[%s485_s2] sm:$0xff] }
   0x3   :  { %v413_v14 = vmov 9   ;;  %v414_v15 = vmov 14   ;;  %v415_v16 = vmov 10   ;;  %v416_v17 = vmov 12   ;;  %v293_v28 = vld [vmem:[%s486_s0] sm:$0xff]  }
   0x4   :  { %v324_v5 = vpack.i.bf16 %v291_v4, %v290_v3  ;;  %v417_v18 = vmov 13   ;;  %v32_v24 = vlaneseq  ;;  %v294_v31 = vunpack.c.l.bf16 %v293_v28 }
   0x5   :  { %v295_v42 = vunpack.c.h.bf16 %v293_v28 }
   0x6   :  { %325 = vperm.xlu1 %323, %v324_v5   ;;  %313 = vperm.xlu0 %311, %v324_v5   ;;  %v33_v26 = vshrl.u32 %v32_v24, 7 }
   0x8   :  { %v62_v30 = vsub.s32 2, %v33_v26  ;;  %v34_v32 = vsub.s32 0, %v33_v26  ;;  %v76_v33 = vsub.s32 3, %v33_v26  ;;  %v48_v34 = vsub.s32 1, %v33_v26 }
   0x9   :  { %v90_v35 = vsub.s32 4, %v33_v26  ;;  %v104_v38 = vsub.s32 5, %v33_v26  ;;  %v118_v40 = vsub.s32 6, %v33_v26  ;;  %v132_v41 = vsub.s32 7, %v33_v26 }
   0xa   :  { %329 = vset.pattern.permute.xlu1 %v405_v6  ;;  %317 = vset.pattern.permute.xlu0 %v406_v7  ;;  %v63_v39 = vrot.slane %v294_v31, %v62_v30  ;;  %v35_v43 = vrot.slane %v294_v31, %v34_v32  ;;  %v77_v46 = vrot.slane %v294_v31, %v76_v33 }
   0xb   :  { %331 = vperm.xlu1 %329, %v324_v5   ;;  %319 = vperm.xlu0 %317, %v324_v5   ;;  %v49_v49 = vrot.slane %v294_v31, %v48_v34  ;;  %v91_v50 = vrot.slane %v294_v31, %v90_v35  ;;  %v105_v57 = vrot.slane %v294_v31, %v104_v38 }
   0xc   :  { %v119_v58 = vrot.slane %v294_v31, %v118_v40  ;;  %v133_v59 = vrot.slane %v294_v31, %v132_v41  ;;  %v460_v60 = vrot.slane %v295_v42, %v48_v34  ;;  %v147_v63 = vrot.slane %v295_v42, %v34_v32 }
   0xd   :  { %v175_v0 = vrot.slane %v295_v42, %v62_v30  ;;  %v189_v3 = vrot.slane %v295_v42, %v76_v33  ;;  %v462_v4 = vrot.slane %v295_v42, %v90_v35 }
   0xf   :  { %335 = vset.pattern.permute.xlu1 %v407_v8  ;;  %341 = vset.pattern.permute.xlu0 %v408_v9 }
  0x10   :  { %337 = vperm.xlu1 %335, %v324_v5   ;;  %343 = vperm.xlu0 %341, %v324_v5  }
  0x14   :  { %347 = vset.pattern.permute.xlu1 %v409_v10  ;;  %359 = vset.pattern.permute.xlu0 %v410_v11 }
  0x15   :  { %349 = vperm.xlu1 %347, %v324_v5   ;;  %361 = vperm.xlu0 %359, %v324_v5  }
  0x19   :  { %353 = vset.pattern.permute.xlu1 %v411_v12  ;;  %377 = vset.pattern.permute.xlu0 %v412_v13  ;;  %v217_v13 = vrot.slane %v295_v42, %v104_v38 }
  0x1a   :  { %355 = vperm.xlu1 %353, %v324_v5   ;;  %379 = vperm.xlu0 %377, %v324_v5  }
  0x1e   :  { %365 = vset.pattern.permute.xlu1 %v413_v14  ;;  %395 = vset.pattern.permute.xlu0 %v414_v15  ;;  %v231_v14 = vrot.slane %v295_v42, %v118_v40 }
  0x1f   :  { %367 = vperm.xlu1 %365, %v324_v5   ;;  %397 = vperm.xlu0 %395, %v324_v5  }
  0x23   :  { %371 = vset.pattern.permute.xlu1 %v415_v16  ;;  %402 = vset.pattern.permute.xlu0 %v404_v1 }
  0x24   :  { %373 = vperm.xlu1 %371, %v324_v5  }
  0x28   :  { %383 = vset.pattern.permute.xlu1 %v416_v17 }
  0x29   :  { %385 = vperm.xlu1 %383, %v324_v5  }
  0x2d   :  { %389 = vset.pattern.permute.xlu1 %v417_v18 }
  0x2e   :  { %391 = vperm.xlu1 %389, %v324_v5  }
  0x32   :  { %401 = vset.pattern.permute.xlu1 %v404_v1 }
  0x33   :  { %266 = vperm.xlu1 %401, %v262_v19  }
  0x37   :  { %271 = vperm.xlu1 %401, %v263_v20  }
  0x81   :  { %v326_v21 = vpop.permute.xlu1 %325  ;;  %v314_v23 = vpop.permute.xlu0 %313 }
  0x82   :  { %v328_v47 = vunpack.i.h.bf16 %v326_v21  ;;  %v327_v48 = vunpack.i.l.bf16 %v326_v21  ;;  %v316_v52 = vunpack.i.h.bf16 %v314_v23  ;;  %v315_v53 = vunpack.i.l.bf16 %v314_v23 }
  0x84   :  { %v64_v1 = vmul.f32 %v327_v48, %v63_v39  ;;  %v65_v2 = vmul.f32 %v328_v47, %v63_v39  ;;  %v36_v5 = vmul.f32 %v315_v53, %v35_v43  ;;  %v37_v6 = vmul.f32 %v316_v52, %v35_v43 }
  0x86   :  { %v332_v22 = vpop.permute.xlu1 %331  ;;  %v320_v27 = vpop.permute.xlu0 %319 }
  0x87   :  { %v334_v44 = vunpack.i.h.bf16 %v332_v22  ;;  %v333_v45 = vunpack.i.l.bf16 %v332_v22  ;;  %v322_v54 = vunpack.i.h.bf16 %v320_v27  ;;  %v321_v55 = vunpack.i.l.bf16 %v320_v27 }
  0x89   :  { %v78_v61 = vmul.f32 %v333_v45, %v77_v46  ;;  %v79_v62 = vmul.f32 %v334_v44, %v77_v46  ;;  %v50_v7 = vmul.f32 %v321_v55, %v49_v49  ;;  %v51_v8 = vmul.f32 %v322_v54, %v49_v49 }
  0x8b   :  { %v447_v25 = vpop.permute.xlu1 %337  ;;  %v344_v36 = vpop.permute.xlu0 %343  ;;  %v236_v15 = vadd.f32 %v78_v61, %v64_v1  ;;  %v237_v16 = vadd.f32 %v79_v62, %v65_v2  ;;  %v234_v23 = vadd.f32 %v50_v7, %v36_v5  ;;  %v235_v24 = vadd.f32 %v51_v8, %v37_v6 }
  0x8c   :  { %v340_v9 = vunpack.i.h.bf16 %v447_v25  ;;  %v339_v10 = vunpack.i.l.bf16 %v447_v25  ;;  %v346_v17 = vunpack.i.h.bf16 %v344_v36  ;;  %v345_v18 = vunpack.i.l.bf16 %v344_v36 }
  0x8e   :  { %v92_v27 = vmul.f32 %v339_v10, %v91_v50  ;;  %v93_v28 = vmul.f32 %v340_v9, %v91_v50  ;;  %v106_v32 = vmul.f32 %v345_v18, %v105_v57  ;;  %v107_v33 = vmul.f32 %v346_v17, %v105_v57 }
  0x90   :  { %v452_v29 = vpop.permute.xlu1 %349  ;;  %v456_v51 = vpop.permute.xlu0 %361  ;;  %v238_v49 = vadd.f32 %v106_v32, %v92_v27  ;;  %v239_v50 = vadd.f32 %v107_v33, %v93_v28 }
  0x91   :  { %v352_v19 = vunpack.i.h.bf16 %v452_v29  ;;  %v351_v20 = vunpack.i.l.bf16 %v452_v29  ;;  %v364_v34 = vunpack.i.h.bf16 %v456_v51  ;;  %v363_v35 = vunpack.i.l.bf16 %v456_v51 }
  0x93   :  { %v120_v38 = vmul.f32 %v351_v20, %v119_v58  ;;  %v121_v39 = vmul.f32 %v352_v19, %v119_v58  ;;  %v148_v55 = vmul.f32 %v363_v35, %v147_v63  ;;  %v149_v57 = vmul.f32 %v364_v34, %v147_v63 }
  0x94   :  { %v249_v19 = vadd.f32 %v237_v16, %v235_v24 }
  0x95   :  { %v454_v37 = vpop.permute.xlu1 %355  ;;  %v380_v12 = vpop.permute.xlu0 %379 }
  0x96   :  { %v358_v21 = vunpack.i.h.bf16 %v454_v37  ;;  %v357_v22 = vunpack.i.l.bf16 %v454_v37  ;;  %v382_v26 = vunpack.i.h.bf16 %v380_v12  ;;  %v381_v25 = vunpack.i.l.bf16 %v380_v12 }
  0x98   :  { %v134_v40 = vmul.f32 %v357_v22, %v133_v59  ;;  %v135_v37 = vmul.f32 %v358_v21, %v133_v59  ;;  %v190_v43 = vmul.f32 %v381_v25, %v189_v3  ;;  %v191_v44 = vmul.f32 %v382_v26, %v189_v3 }
  0x9a   :  { %v458_v56 = vpop.permute.xlu1 %367  ;;  %v398_v29 = vpop.permute.xlu0 %397  ;;  %v240_v53 = vadd.f32 %v134_v40, %v120_v38  ;;  %v241_v54 = vadd.f32 %v135_v37, %v121_v39 }
  0x9b   :  { %v370_v41 = vunpack.i.h.bf16 %v458_v56  ;;  %v369_v42 = vunpack.i.l.bf16 %v458_v56  ;;  %v400_v47 = vunpack.i.h.bf16 %v398_v29  ;;  %v399_v48 = vunpack.i.l.bf16 %v398_v29 }
  0x9c   :  { %v250_v9 = vadd.f32 %v240_v53, %v238_v49  ;;  %v251_v10 = vadd.f32 %v241_v54, %v239_v50 }
  0x9d   :  { %v162_v59 = vmul.f32 %v369_v42, %v460_v60  ;;  %v163_v61 = vmul.f32 %v370_v41, %v460_v60  ;;  %v233_v3 = vmul.f32 %v400_v47, %v231_v14  ;;  %v248_v60 = vadd.f32 %v236_v15, %v234_v23 }
  0x9e   :  { %v257_v27 = vadd.f32 %v251_v10, %v249_v19 }
  0x9f   :  { %v374_v11 = vpop.permute.xlu1 %373  ;;  %v242_v63 = vadd.f32 %v162_v59, %v148_v55 }
  0xa0   :  { %v376_v30 = vunpack.i.h.bf16 %v374_v11  ;;  %v375_v31 = vunpack.i.l.bf16 %v374_v11  ;;  %v243_v11 = vadd.f32 %v163_v61, %v149_v57 }
  0xa2   :  { %v176_v45 = vmul.f32 %v375_v31, %v175_v0  ;;  %v177_v46 = vmul.f32 %v376_v30, %v175_v0  ;;  %v232_v0 = vmul.f32 %v399_v48, %v231_v14  ;;  %v256_v14 = vadd.f32 %v250_v9, %v248_v60 }
  0xa4   :  { %v386_v36 = vpop.permute.xlu1 %385  ;;  %v244_v1 = vadd.f32 %v190_v43, %v176_v45  ;;  %v245_v2 = vadd.f32 %v191_v44, %v177_v46 }
  0xa5   :  { %v388_v52 = vunpack.i.h.bf16 %v386_v36  ;;  %v387_v51 = vunpack.i.l.bf16 %v386_v36 }
  0xa6   :  { %v252_v22 = vadd.f32 %v244_v1, %v242_v63  ;;  %v253_v26 = vadd.f32 %v245_v2, %v243_v11 }
  0xa7   :  { %v204_v5 = vmul.f32 %v387_v51, %v462_v4  ;;  %v205_v6 = vmul.f32 %v388_v52, %v462_v4 }
  0xa9   :  { %v392_v58 = vpop.permute.xlu1 %391 }
  0xaa   :  { %v394_v56 = vunpack.i.h.bf16 %v392_v58  ;;  %v393_v62 = vunpack.i.l.bf16 %v392_v58 }
  0xac   :  { %v218_v7 = vmul.f32 %v393_v62, %v217_v13  ;;  %v219_v8 = vmul.f32 %v394_v56, %v217_v13 }
  0xae   :  { %v246_v12 = vadd.f32 %v218_v7, %v204_v5  ;;  %v247_v17 = vadd.f32 %v219_v8, %v205_v6  ;;  %v267_v18 = vpop.permute.xlu1 %266 }
  0xb0   :  { %v254_v20 = vadd.f32 %v246_v12, %v232_v0  ;;  %v255_v21 = vadd.f32 %v247_v17, %v233_v3 }
  0xb2   :  { %v258_v25 = vadd.f32 %v254_v20, %v252_v22  ;;  %v259_v28 = vadd.f32 %v255_v21, %v253_v26  ;;  %v272_v13 = vpop.permute.xlu1 %271 }
  0xb4   :  { %v260_v4 = vadd.f32 %v258_v25, %v256_v14  ;;  %v261_v30 = vadd.f32 %v259_v28, %v257_v27 }
  0xb6   :  { %v274_v31 = vadd.f32 %v267_v18, %v260_v4  ;;  %v275_v32 = vadd.f32 %v272_v13, %v261_v30 }
  0xb8   :  { %vm276_vm0 = vcmp.ge.f32.partialorder %v274_v31, 0.0  ;;  %v278_v33 = vmul.f32 0.2, %v274_v31  ;;  %vm277_vm1 = vcmp.ge.f32.partialorder %v275_v32, 0.0  ;;  %v279_v34 = vmul.f32 0.2, %v275_v32 }
  0xba   :  { %v280_v35 = vsel %vm276_vm0, %v274_v31, %v278_v33  ;;  %v281_v15 = vsel %vm277_vm1, %v275_v32, %v279_v34 }
  0xbb   :  { %282 = vst [vmem:[%s487_s3] sm:$0xff] %v280_v35  ;;  %283 = vst [vmem:[%s487_s3 + $0x8] sm:$0xff] %v281_v15 }

// kernel: fwd.6
= control target key start
LH: loop header
LB: loop body
LE: loop exit
PB: predicated region body
PF: predicated region fallthrough
CT: control target
= control target key end

     0   :  { %s563_s12 = smov 0   ;;  %s565_s13 = smov 0   ;;  %s611_s0 = inlined_call_operand.vmem [shape: bf16[4,84,64], index: 0, kind: input, shape index: {}]   ;;  %s612_s1 = inlined_call_operand.vmem [shape: bf16[4,8,84], index: 1, kind: input, shape index: {}]   ;;  %s613_s2 = inlined_call_operand.vmem [shape: f32[4,8,1], index: 2, kind: input, shape index: {}]   ;;  %s614_s3 = inlined_call_operand.vmem [shape: f32[4,8,64], index: 3, kind: output, shape index: {}]  }
   0x1   :  { %s567_s14 = smov 0  }
   0x2 LB: > { %s25_s15 = sadd.s32 1, %s534_s13  ;;  %p444_p0 = scmp.ge.s32.totalorder %s538_s14, 1  ;;  %s538_s14 = sphi %s567_s14, %s13_s14   ;;  %s534_s13 = sphi %s565_s13, %s616_s13   ;;  %s530_s12 = sphi %s563_s12, %s615_s12  }
   0x3   : > { %p27_p1 = scmp.ge.s32.totalorder %s25_s15, 4  ;;  %p174_p2 = scmp.lt.s32.totalorder %s538_s14, 5 }
   0x5   : > { %s618_s15 = smov (%p27_p1, %s25_s15), 0  ;;  %p175_p3 = pnand %p444_p0, %p174_p2 }
   0x6   : > { %p211_p4 = scmp.lt.s32.totalorder (!%p175_p3), %s530_s12, 3 }
   0x7   : > { %178 = sbr.rel (%p175_p3) target bundleno = 240 (0xf0), region = 32 }
   0xc   : > { %v540_v0 = vmov 0.0   ;;  %vm541_vm0 = vmmov 0   ;;  %s620_s12 = smov (!%p211_p4, %s530_s12), 3  ;;  %v542_v1 = vmov 0   ;;  %vm290_vm1 = vcmask 1041408  }
   0xd   : > { %465 = vmatprep.subr.bf16.mxu0 %v540_v0  ;;  %477 = vmatprep.mubr.msk.bf16.mxu0 %vm541_vm0, %v540_v0  ;;  %s481_s16 = smul.u32 44, %s620_s12  ;;  %s447_s20 = sshll.u32 %s620_s12, 3  ;;  %vm286_vm2 = vcmask 687104   ;;  %vm337_vm4 = vcmask 523264  }
   0xe   : > { %509 = vset.pattern.permute.xlu0 %v542_v1  ;;  %s226_s23 = scalar_lea.vmem %s613_s2, %s447_s20  ;;  %s446_s24 = sshll.u32 %s620_s12, 2 }
   0xf   : > { %s218_s19 = scalar_lea.vmem %s611_s0, %s481_s16  ;;  %v247_v5 = vld [vmem:[%s226_s23] sm:$0xff]  ;;  %s222_s27 = scalar_lea.vmem %s612_s1, %s446_s24 }
  0x10   : > { %v510_v2 = vld [vmem:[%s218_s19 + $0x28] ss:$0 sps:$4 sm:$0x33]   ;;  %v511_v4 = vld [vmem:[%s218_s19 + $0x20] sm:$0xff]   ;;  %250 = vperm.xlu0 %509, %v247_v5   ;;  %v512_v6 = vld [vmem:[%s218_s19 + $0x18] sm:$0xff]   ;;  %s233_s30 = scalar_lea.vmem %s614_s3, %s447_s20 }
  0x11   : > { %v292_v3 = vsel %vm290_vm1, %v510_v2, 0  ;;  %v513_v7 = vld [vmem:[%s218_s19 + $0x10] sm:$0xff]   ;;  %v514_v8 = vld [vmem:[%s218_s19 + $0x8] sm:$0xff]   ;;  %v515_v9 = vld [vmem:[%s218_s19] sm:$0xff]  }
  0x12   : > { %466 = vmatpush3.bf16.msra.mxu0 %v292_v3  ;;  %v235_v10 = vld [vmem:[%s222_s27] sm:$0xf] }
  0x13   : > { %467 = vmatprep.subr.bf16.mxu0 %v540_v0 }
  0x16   : > { %468 = vmatpush3.bf16.msra.mxu0 %v511_v4 }
  0x17   : > { %469 = vmatprep.subr.bf16.mxu0 %v540_v0 }
  0x1a   : > { %470 = vmatpush3.bf16.msra.mxu0 %v512_v6 }
  0x1b   : > { %471 = vmatprep.subr.bf16.mxu0 %v540_v0 }
  0x1e   : > { %472 = vmatpush3.bf16.msra.mxu0 %v513_v7 }
  0x1f   : > { %473 = vmatprep.subr.bf16.mxu0 %v540_v0 }
  0x22   : > { %474 = vmatpush3.bf16.msra.mxu0 %v514_v8 }
  0x23   : > { %475 = vmatprep.subr.bf16.mxu0 %v540_v0 }
  0x26   : > { %476 = vmatpush3.bf16.msra.mxu0 %v515_v9 }
  0x29   : > { %478 = vmatmul.mubr.msk.bf16.vlgmr.msra.gmra.mxu0 %vm286_vm2, %v235_v10 }
  0x8b   : > { %v251_v11 = vpop.permute.xlu0 %250 }
  0xe9   : > { %v328_v12 = vpop.f32.mrf.mxu0 }
  0xea   : > { %v329_v13 = vadd.f32 %v328_v12, %v251_v11 }
  0xeb   : > { %v479_v14 = vpop.f32.mrf.mxu0 }
  0xec   : > { %vm334_vm3 = vcmp.ge.f32.partialorder %v329_v13, 0.0  ;;  %v335_v15 = vmul.f32 0.2, %v329_v13 }
  0xed   : > { %v331_v16 = vpop.f32.mrf.mxu0 }
  0xee   : > { %v336_v17 = vsel %vm334_vm3, %v329_v13, %v335_v15 }
  0xef   : > { %338 = vst.msk [vmem:[%s233_s30] sm:$0xff] %vm337_vm4, %v336_v17  ;;  %v480_v18 = vpop.f32.mrf.mxu0 }
  0xf0 PF: > { %s13_s14 = sadd.s32 1, %s538_s14   ;;  %s615_s12 = smov %s534_s13 }
  0xf1   : > { %p10_p5 = scmp.ge.s32.totalorder %s13_s14, 6   ;;  %s616_s13 = smov %s618_s15 }
  0xf3   :  { %12 = sbr.rel (!%p10_p5) target bundleno = 2 (0x2), region = 68 }

// kernel: fwd.7
= control target key start
LH: loop header
LB: loop body
LE: loop exit
PB: predicated region body
PF: predicated region fallthrough
CT: control target
= control target key end

     0   :  { %s563_s12 = smov 0   ;;  %s565_s13 = smov 0   ;;  %s611_s0 = inlined_call_operand.vmem [shape: bf16[8,84,32], index: 0, kind: input, shape index: {}]   ;;  %s612_s1 = inlined_call_operand.vmem [shape: bf16[8,8,84], index: 1, kind: input, shape index: {}]   ;;  %s613_s2 = inlined_call_operand.vmem [shape: f32[8,8,1], index: 2, kind: input, shape index: {}]   ;;  %s614_s3 = inlined_call_operand.vmem [shape: f32[8,8,32], index: 3, kind: output, shape index: {}]  }
   0x1   :  { %s567_s14 = smov 0  }
   0x2 LB: > { %s25_s15 = sadd.s32 1, %s534_s13  ;;  %p444_p0 = scmp.ge.s32.totalorder %s538_s14, 1  ;;  %s538_s14 = sphi %s567_s14, %s13_s14   ;;  %s534_s13 = sphi %s565_s13, %s616_s13   ;;  %s530_s12 = sphi %s563_s12, %s615_s12  }
   0x3   : > { %p27_p1 = scmp.ge.s32.totalorder %s25_s15, 8  ;;  %p174_p2 = scmp.lt.s32.totalorder %s538_s14, 9 }
   0x5   : > { %s618_s15 = smov (%p27_p1, %s25_s15), 0  ;;  %p175_p3 = pnand %p444_p0, %p174_p2 }
   0x6   : > { %p211_p4 = scmp.lt.s32.totalorder (!%p175_p3), %s530_s12, 7 }
   0x7   : > { %178 = sbr.rel (%p175_p3) target bundleno = 240 (0xf0), region = 32 }
   0xc   : > { %v540_v0 = vmov 0.0   ;;  %vm541_vm0 = vmmov 0   ;;  %s620_s12 = smov (!%p211_p4, %s530_s12), 7  ;;  %v542_v1 = vmov 0   ;;  %vm290_vm1 = vcmask 1041408  }
   0xd   : > { %465 = vmatprep.subr.bf16.mxu0 %v540_v0  ;;  %477 = vmatprep.mubr.msk.bf16.mxu0 %vm541_vm0, %v540_v0  ;;  %s481_s16 = smul.u32 44, %s620_s12  ;;  %s447_s20 = sshll.u32 %s620_s12, 3  ;;  %vm286_vm2 = vcmask 687104   ;;  %vm337_vm4 = vcmask 261120  }
   0xe   : > { %509 = vset.pattern.permute.xlu0 %v542_v1  ;;  %s226_s23 = scalar_lea.vmem %s613_s2, %s447_s20  ;;  %s446_s24 = sshll.u32 %s620_s12, 2 }
   0xf   : > { %s218_s19 = scalar_lea.vmem %s611_s0, %s481_s16  ;;  %v247_v5 = vld [vmem:[%s226_s23] sm:$0xff]  ;;  %s222_s27 = scalar_lea.vmem %s612_s1, %s446_s24 }
  0x10   : > { %v510_v2 = vld [vmem:[%s218_s19 + $0x28] ss:$0 sps:$4 sm:$0x33]   ;;  %v511_v4 = vld [vmem:[%s218_s19 + $0x20] sm:$0xff]   ;;  %250 = vperm.xlu0 %509, %v247_v5   ;;  %v512_v6 = vld [vmem:[%s218_s19 + $0x18] sm:$0xff]   ;;  %s233_s30 = scalar_lea.vmem %s614_s3, %s447_s20 }
  0x11   : > { %v292_v3 = vsel %vm290_vm1, %v510_v2, 0  ;;  %v513_v7 = vld [vmem:[%s218_s19 + $0x10] sm:$0xff]   ;;  %v514_v8 = vld [vmem:[%s218_s19 + $0x8] sm:$0xff]   ;;  %v515_v9 = vld [vmem:[%s218_s19] sm:$0xff]  }
  0x12   : > { %466 = vmatpush3.bf16.msra.mxu0 %v292_v3  ;;  %v235_v10 = vld [vmem:[%s222_s27] sm:$0xf] }
  0x13   : > { %467 = vmatprep.subr.bf16.mxu0 %v540_v0 }
  0x16   : > { %468 = vmatpush3.bf16.msra.mxu0 %v511_v4 }
  0x17   : > { %469 = vmatprep.subr.bf16.mxu0 %v540_v0 }
  0x1a   : > { %470 = vmatpush3.bf16.msra.mxu0 %v512_v6 }
  0x1b   : > { %471 = vmatprep.subr.bf16.mxu0 %v540_v0 }
  0x1e   : > { %472 = vmatpush3.bf16.msra.mxu0 %v513_v7 }
  0x1f   : > { %473 = vmatprep.subr.bf16.mxu0 %v540_v0 }
  0x22   : > { %474 = vmatpush3.bf16.msra.mxu0 %v514_v8 }
  0x23   : > { %475 = vmatprep.subr.bf16.mxu0 %v540_v0 }
  0x26   : > { %476 = vmatpush3.bf16.msra.mxu0 %v515_v9 }
  0x29   : > { %478 = vmatmul.mubr.msk.bf16.vlgmr.msra.gmra.mxu0 %vm286_vm2, %v235_v10 }
  0x8b   : > { %v251_v11 = vpop.permute.xlu0 %250 }
  0xe9   : > { %v328_v12 = vpop.f32.mrf.mxu0 }
  0xea   : > { %v329_v13 = vadd.f32 %v328_v12, %v251_v11 }
  0xeb   : > { %v479_v14 = vpop.f32.mrf.mxu0 }
  0xec   : > { %vm334_vm3 = vcmp.ge.f32.partialorder %v329_v13, 0.0  ;;  %v335_v15 = vmul.f32 0.2, %v329_v13 }
  0xed   : > { %v331_v16 = vpop.f32.mrf.mxu0 }
  0xee   : > { %v336_v17 = vsel %vm334_vm3, %v329_v13, %v335_v15 }
  0xef   : > { %338 = vst.msk [vmem:[%s233_s30] sm:$0xff] %vm337_vm4, %v336_v17  ;;  %v480_v18 = vpop.f32.mrf.mxu0 }
  0xf0 PF: > { %s13_s14 = sadd.s32 1, %s538_s14   ;;  %s615_s12 = smov %s534_s13 }
  0xf1   : > { %p10_p5 = scmp.ge.s32.totalorder %s13_s14, 10   ;;  %s616_s13 = smov %s618_s15 }
  0xf3   :  { %12 = sbr.rel (!%p10_p5) target bundleno = 2 (0x2), region = 68 }

// kernel: fwd.8
= control target key start
LH: loop header
LB: loop body
LE: loop exit
PB: predicated region body
PF: predicated region fallthrough
CT: control target
= control target key end

     0   :  { %v934_v1 = vmov 0   ;;  %vm423_vm0 = vcmask 523264   ;;  %vm690_vm1 = vcmask 261120   ;;  %s1252_s0 = inlined_call_operand.vmem [shape: bf16[1,320,32], index: 0, kind: input, shape index: {}]   ;;  %s1253_s1 = inlined_call_operand.vmem [shape: bf16[1,128,320], index: 1, kind: input, shape index: {}]   ;;  %s1254_s2 = inlined_call_operand.vmem [shape: f32[1,128,1], index: 2, kind: input, shape index: {}]   ;;  %s1255_s3 = inlined_call_operand.vmem [shape: f32[1,128,32], index: 3, kind: output, shape index: {}]  }
   0x1   :  { %v882_v0 = vld [vmem:[%s1252_s0 + $0x78] sm:$0xff]   ;;  %880 = vset.pattern.permute.xlu0 %v934_v1  ;;  %881 = vset.pattern.permute.xlu1 %v934_v1  ;;  %v884_v3 = vld [vmem:[%s1252_s0 + $0x70] sm:$0xff]   ;;  %v886_v5 = vld [vmem:[%s1252_s0 + $0x68] sm:$0xff]  }
   0x2   :  { %v883_v2 = vld [vmem:[%s1252_s0 + $0x38] sm:$0xff]   ;;  %763 = vmatprep.subr.bf16.mxu0 %v882_v0  ;;  %863 = vmatprep.subr.bf16.mxu1 %v882_v0  ;;  %v885_v4 = vld [vmem:[%s1252_s0 + $0x30] sm:$0xff]   ;;  %v887_v6 = vld [vmem:[%s1252_s0 + $0x28] sm:$0xff]  }
   0x3   :  { %764 = vmatpush3.bf16.msra.mxu0 %v883_v2  ;;  %871 = vmatpush3.bf16.msra.mxu1 %v883_v2  ;;  %v888_v7 = vld [vmem:[%s1252_s0 + $0x60] sm:$0xff]   ;;  %v890_v9 = vld [vmem:[%s1252_s0 + $0x58] sm:$0xff]   ;;  %v892_v11 = vld [vmem:[%s1252_s0 + $0x50] sm:$0xff]  }
   0x4   :  { %765 = vmatprep.subr.bf16.mxu0 %v884_v3  ;;  %864 = vmatprep.subr.bf16.mxu1 %v884_v3  ;;  %v889_v8 = vld [vmem:[%s1252_s0 + $0x20] sm:$0xff]   ;;  %v891_v10 = vld [vmem:[%s1252_s0 + $0x18] sm:$0xff]   ;;  %v893_v14 = vld [vmem:[%s1252_s0 + $0x10] sm:$0xff]  }
   0x5   :  { %v900_v12 = vld [vmem:[%s1253_s1 + $0x4] ss:$12 sps:$4 sm:$0xff]   ;;  %v903_v13 = vld [vmem:[%s1253_s1 + $0x94] ss:$12 sps:$4 sm:$0xff]   ;;  %v894_v15 = vld [vmem:[%s1252_s0 + $0x48] sm:$0xff]  }
   0x6   :  { %480 = vmatprep.mubr.bf16.mxu0 %v900_v12  ;;  %528 = vmatprep.mubr.bf16.mxu1 %v903_v13  ;;  %v895_v16 = vld [vmem:[%s1252_s0 + $0x8] sm:$0xff]   ;;  %v896_v17 = vld [vmem:[%s1252_s0 + $0x40] sm:$0xff]   ;;  %v904_v19 = vld [vmem:[%s1252_s0 + $0x98] sm:$0xff]  }
   0x7   :  { %766 = vmatpush3.bf16.msra.mxu0 %v885_v4  ;;  %872 = vmatpush3.bf16.msra.mxu1 %v885_v4  ;;  %v897_v18 = vld [vmem:[%s1252_s0] sm:$0xff]   ;;  %v901_v21 = vld [vmem:[%s1253_s1 + $0x90] ss:$12 sps:$4 sm:$0xff]   ;;  %v908_v24 = vld [vmem:[%s1253_s1 + $0xac] ss:$12 sps:$4 sm:$0xff]  }
   0x8   :  { %767 = vmatprep.subr.bf16.mxu0 %v886_v5  ;;  %865 = vmatprep.subr.bf16.mxu1 %v886_v5  ;;  %v898_v20 = vld [vmem:[%s1253_s1] ss:$12 sps:$4 sm:$0xff]   ;;  %v905_v22 = vld [vmem:[%s1252_s0 + $0x90] sm:$0xff]   ;;  %v906_v23 = vld [vmem:[%s1253_s1 + $0x1c] ss:$12 sps:$4 sm:$0xff]  }
   0x9   :  { %v912_v25 = vld [vmem:[%s1252_s0 + $0x88] sm:$0xff]   ;;  %v910_v26 = vld [vmem:[%s1253_s1 + $0x18] ss:$12 sps:$4 sm:$0xff]   ;;  %v914_v29 = vld [vmem:[%s1253_s1 + $0x34] ss:$12 sps:$4 sm:$0xff]  }
   0xa   :  { %v911_v27 = vld [vmem:[%s1253_s1 + $0xa8] ss:$12 sps:$4 sm:$0xff]   ;;  %v87_v28 = vld [vmem:[%s1254_s2] sm:$0xff]  ;;  %v90_v34 = vld [vmem:[%s1254_s2 + $0x18] sm:$0xff] }
   0xb   :  { %768 = vmatpush3.bf16.msra.mxu0 %v887_v6  ;;  %873 = vmatpush3.bf16.msra.mxu1 %v887_v6  ;;  %v89_v30 = vld [vmem:[%s1254_s2 + $0x10] sm:$0xff]  ;;  %v913_v31 = vld [vmem:[%s1252_s0 + $0x80] sm:$0xff]   ;;  %v88_v33 = vld [vmem:[%s1254_s2 + $0x8] sm:$0xff] }
   0xc   :  { %769 = vmatprep.subr.bf16.mxu0 %v888_v7  ;;  %866 = vmatprep.subr.bf16.mxu1 %v888_v7  ;;  %v916_v32 = vld [vmem:[%s1253_s1 + $0x8] ss:$12 sps:$4 sm:$0xff]   ;;  %v917_v35 = vld [vmem:[%s1253_s1 + $0x30] ss:$12 sps:$4 sm:$0xff]   ;;  %v918_v36 = vld [vmem:[%s1253_s1 + $0x20] ss:$12 sps:$4 sm:$0xff]  }
   0xd   :  { %105 = vperm.xlu0 %880, %v87_v28   ;;  %115 = vperm.xlu1 %881, %v89_v30   ;;  %v91_v37 = vld [vmem:[%s1254_s2 + $0x20] sm:$0xff]  ;;  %v92_v38 = vld [vmem:[%s1254_s2 + $0x28] sm:$0xff]  ;;  %v93_v41 = vld [vmem:[%s1254_s2 + $0x30] sm:$0xff] }
   0xe   :  { %v919_v39 = vld [vmem:[%s1253_s1 + $0x4c] ss:$12 sps:$4 sm:$0xff]   ;;  %v922_v43 = vld [vmem:[%s1253_s1 + $0x48] ss:$12 sps:$4 sm:$0xff]   ;;  %v923_v44 = vld [vmem:[%s1253_s1 + $0x50] ss:$12 sps:$4 sm:$0xff]  }
   0xf   :  { %770 = vmatpush3.bf16.msra.mxu0 %v889_v8  ;;  %874 = vmatpush3.bf16.msra.mxu1 %v889_v8  ;;  %v921_v40 = vld [vmem:[%s1253_s1 + $0x38] ss:$12 sps:$4 sm:$0xff]   ;;  %v96_v46 = vld [vmem:[%s1254_s2 + $0x48] sm:$0xff]  ;;  %v97_v49 = vld [vmem:[%s1254_s2 + $0x50] sm:$0xff] }
  0x10   :  { %771 = vmatprep.subr.bf16.mxu0 %v890_v9  ;;  %867 = vmatprep.subr.bf16.mxu1 %v890_v9  ;;  %v94_v42 = vld [vmem:[%s1254_s2 + $0x38] sm:$0xff]  ;;  %v95_v45 = vld [vmem:[%s1254_s2 + $0x40] sm:$0xff]  ;;  %v926_v48 = vld [vmem:[%s1253_s1 + $0x68] ss:$12 sps:$4 sm:$0xff]  }
  0x11   :  { %110 = vperm.xlu0 %880, %v88_v33   ;;  %120 = vperm.xlu1 %881, %v90_v34   ;;  %v924_v47 = vld [vmem:[%s1253_s1 + $0x64] ss:$12 sps:$4 sm:$0xff]   ;;  %v98_v50 = vld [vmem:[%s1254_s2 + $0x58] sm:$0xff]  ;;  %v927_v51 = vld [vmem:[%s1253_s1 + $0x60] ss:$12 sps:$4 sm:$0xff]  }
  0x12   :  { %v928_v52 = vld [vmem:[%s1253_s1 + $0x80] ss:$12 sps:$4 sm:$0xff]   ;;  %v929_v55 = vld [vmem:[%s1253_s1 + $0x7c] ss:$12 sps:$4 sm:$0xff]   ;;  %v931_v56 = vld [vmem:[%s1253_s1 + $0x98] ss:$12 sps:$4 sm:$0xff]  }
  0x13   :  { %772 = vmatpush3.bf16.msra.mxu0 %v891_v10  ;;  %875 = vmatpush3.bf16.msra.mxu1 %v891_v10  ;;  %v99_v53 = vld [vmem:[%s1254_s2 + $0x60] sm:$0xff]  ;;  %v100_v54 = vld [vmem:[%s1254_s2 + $0x68] sm:$0xff]  ;;  %v101_v57 = vld [vmem:[%s1254_s2 + $0x70] sm:$0xff] }
  0x14   :  { %773 = vmatprep.subr.bf16.mxu0 %v892_v11  ;;  %868 = vmatprep.subr.bf16.mxu1 %v892_v11  ;;  %v102_v58 = vld [vmem:[%s1254_s2 + $0x78] sm:$0xff] }
  0x15   :  { %125 = vperm.xlu0 %880, %v91_v37   ;;  %130 = vperm.xlu1 %881, %v92_v38   ;;  %v932_v59 = vld [vmem:[%s1253_s1 + $0x78] ss:$12 sps:$4 sm:$0xff]   ;;  %v933_v60 = vld [vmem:[%s1253_s1 + $0xb0] ss:$12 sps:$4 sm:$0xff]  }
  0x17   :  { %774 = vmatpush3.bf16.msra.mxu0 %v893_v14  ;;  %876 = vmatpush3.bf16.msra.mxu1 %v893_v14 }
  0x18   :  { %775 = vmatprep.subr.bf16.mxu0 %v894_v15  ;;  %869 = vmatprep.subr.bf16.mxu1 %v894_v15 }
  0x19   :  { %135 = vperm.xlu0 %880, %v93_v41   ;;  %140 = vperm.xlu1 %881, %v94_v42  }
  0x1b   :  { %776 = vmatpush3.bf16.msra.mxu0 %v895_v16  ;;  %877 = vmatpush3.bf16.msra.mxu1 %v895_v16 }
  0x1c   :  { %777 = vmatprep.subr.bf16.mxu0 %v896_v17  ;;  %870 = vmatprep.subr.bf16.mxu1 %v896_v17 }
  0x1d   :  { %145 = vperm.xlu0 %880, %v95_v45   ;;  %150 = vperm.xlu1 %881, %v96_v46  }
  0x1f   :  { %778 = vmatpush3.bf16.msra.mxu0 %v897_v18  ;;  %878 = vmatpush3.bf16.msra.mxu1 %v897_v18 }
  0x20   :  { %839 = vmatprep.subr.bf16.mxu1 %v904_v19 }
  0x21   :  { %155 = vperm.xlu0 %880, %v97_v49   ;;  %160 = vperm.xlu1 %881, %v98_v50  }
  0x22   :  { %481 = vmatmul.mubr.bf16.vlgmr.msra.gmra.mxu0 %v898_v20  ;;  %529 = vmatmul.mubr.bf16.vlgmr.msra.gmra.mxu1 %v901_v21 }
  0x23   :  { %840 = vmatpush3.bf16.msra.mxu1 %v904_v19  ;;  %488 = vmatprep.mubr.bf16.mxu0 %v906_v23 }
  0x24   :  { %841 = vmatprep.subr.bf16.mxu1 %v905_v22  ;;  %536 = vmatprep.mubr.bf16.mxu1 %v908_v24 }
  0x25   :  { %165 = vperm.xlu0 %880, %v99_v53   ;;  %170 = vperm.xlu1 %881, %v100_v54  }
  0x27   :  { %842 = vmatpush3.bf16.msra.mxu1 %v905_v22 }
  0x28   :  { %843 = vmatprep.subr.bf16.mxu1 %v912_v25 }
  0x29   :  { %175 = vperm.xlu0 %880, %v101_v57   ;;  %180 = vperm.xlu1 %881, %v102_v58  }
  0x2a   :  { %489 = vmatmul.mubr.bf16.gmra.mxu0 %v910_v26  ;;  %537 = vmatmul.mubr.bf16.gmra.mxu1 %v911_v27 }
  0x2b   :  { %844 = vmatpush3.bf16.msra.mxu1 %v912_v25  ;;  %496 = vmatprep.mubr.bf16.mxu0 %v914_v29 }
  0x2c   :  { %845 = vmatprep.subr.bf16.mxu1 %v913_v31  ;;  %847 = vmatprep.mubr.msk.bf16.mxu1 %vm423_vm0, %v916_v32 }
  0x2f   :  { %846 = vmatpush3.bf16.msra.mxu1 %v913_v31 }
  0x32   :  { %497 = vmatmul.mubr.bf16.gmra.mxu0 %v917_v35  ;;  %848 = vmatmul.mubr.msk.bf16.vlgmr.msra.gmra.mxu1 %vm423_vm0, %v918_v36 }
  0x33   :  { %504 = vmatprep.mubr.bf16.mxu0 %v919_v39  ;;  %851 = vmatprep.mubr.msk.bf16.mxu1 %vm423_vm0, %v921_v40 }
  0x3a   :  { %505 = vmatmul.mubr.bf16.gmra.mxu0 %v922_v43  ;;  %852 = vmatmul.mubr.msk.bf16.gmra.mxu1 %vm423_vm0, %v923_v44 }
  0x3b   :  { %512 = vmatprep.mubr.bf16.mxu0 %v924_v47  ;;  %855 = vmatprep.mubr.msk.bf16.mxu1 %vm423_vm0, %v926_v48 }
  0x42   :  { %513 = vmatmul.mubr.bf16.gmra.mxu0 %v927_v51  ;;  %856 = vmatmul.mubr.msk.bf16.gmra.mxu1 %vm423_vm0, %v928_v52 }
  0x43   :  { %520 = vmatprep.mubr.bf16.mxu0 %v929_v55  ;;  %859 = vmatprep.mubr.msk.bf16.mxu1 %vm423_vm0, %v931_v56 }
  0x4a   :  { %521 = vmatmul.mubr.bf16.gmra.mxu0 %v932_v59  ;;  %860 = vmatmul.mubr.msk.bf16.gmra.mxu1 %vm423_vm0, %v933_v60 }
  0x88   :  { %v106_v61 = vpop.permute.xlu0 %105  ;;  %v116_v62 = vpop.permute.xlu1 %115 }
  0x8c   :  { %v111_v1 = vpop.permute.xlu0 %110  ;;  %v121_v6 = vpop.permute.xlu1 %120 }
  0x90   :  { %v126_v9 = vpop.permute.xlu0 %125  ;;  %v1155_v14 = vpop.permute.xlu1 %130 }
  0x94   :  { %v136_v18 = vpop.permute.xlu0 %135  ;;  %v1161_v26 = vpop.permute.xlu1 %140 }
  0x98   :  { %v1163_v32 = vpop.permute.xlu0 %145  ;;  %v1169_v45 = vpop.permute.xlu1 %150 }
  0x9c   :  { %v1175_v51 = vpop.permute.xlu0 %155 }
  0xe2   :  { %v779_v63 = vpop.f32.mrf.mxu0  ;;  %v1143_v0 = vpop.f32.mrf.mxu1 }
  0xe4   :  { %v780_v2 = vpop.f32.mrf.mxu0  ;;  %v1145_v3 = vpop.f32.mrf.mxu1 }
  0xe5   :  { %v781_v19 = vadd.f32 %v780_v2, %v779_v63  ;;  %v1181_v63 = vpop.permute.xlu1 %160 }
  0xe6   :  { %v782_v4 = vpop.f32.mrf.mxu0  ;;  %v1147_v5 = vpop.f32.mrf.mxu1 }
  0xe7   :  { %v483_v28 = vadd.f32 %v781_v19, %v106_v61 }
  0xe8   :  { %v783_v7 = vpop.f32.mrf.mxu0  ;;  %v1149_v8 = vpop.f32.mrf.mxu1 }
  0xe9   :  { %v784_v29 = vadd.f32 %v783_v7, %v782_v4 }
  0xea   :  { %v785_v10 = vpop.f32.mrf.mxu0  ;;  %v1151_v11 = vpop.f32.mrf.mxu1 }
  0xeb   :  { %v486_v43 = vadd.f32 %v784_v29, %v111_v1 }
  0xec   :  { %v786_v12 = vpop.f32.mrf.mxu0  ;;  %v1153_v13 = vpop.f32.mrf.mxu1 }
  0xed   :  { %v787_v15 = vadd.f32 %v786_v12, %v785_v10 }
  0xee   :  { %v788_v16 = vpop.f32.mrf.mxu0  ;;  %v1157_v17 = vpop.f32.mrf.mxu1 }
  0xef   :  { %v491_v23 = vadd.f32 %v787_v15, %v116_v62 }
  0xf0   :  { %v789_v20 = vpop.f32.mrf.mxu0  ;;  %v1159_v21 = vpop.f32.mrf.mxu1 }
  0xf1   :  { %v790_v22 = vadd.f32 %v789_v20, %v788_v16 }
  0xf2   :  { %v791_v24 = vpop.f32.mrf.mxu0  ;;  %v849_v25 = vpop.f32.mrf.mxu1 }
  0xf3   :  { %v588_v27 = vadd.f32 %v849_v25, %v491_v23  ;;  %v494_v35 = vadd.f32 %v790_v22, %v121_v6  ;;  %v171_v25 = vpop.permute.xlu1 %170 }
  0xf4   :  { %v792_v30 = vpop.f32.mrf.mxu0  ;;  %v579_v31 = vpop.f32.mrf.mxu1 }
  0xf5   :  { %vm644_vm2 = vcmp.ge.f32.partialorder %v588_v27, 0.0  ;;  %v660_v33 = vmul.f32 0.2, %v588_v27  ;;  %v580_v34 = vadd.f32 %v579_v31, %v483_v28  ;;  %v793_v36 = vadd.f32 %v792_v30, %v791_v24 }
  0xf6   :  { %v794_v37 = vpop.f32.mrf.mxu0  ;;  %v850_v38 = vpop.f32.mrf.mxu1 }
  0xf7   :  { %v676_v39 = vsel %vm644_vm2, %v588_v27, %v660_v33  ;;  %vm642_vm3 = vcmp.ge.f32.partialorder %v580_v34, 0.0  ;;  %v658_v40 = vmul.f32 0.2, %v580_v34  ;;  %v591_v41 = vadd.f32 %v850_v38, %v494_v35 }
  0xf8   :  { %693 = vst.msk [vmem:[%s1255_s3 + $0x10] sm:$0xff] %vm690_vm1, %v676_v39  ;;  %v795_v42 = vpop.f32.mrf.mxu0  ;;  %v582_v44 = vpop.f32.mrf.mxu1  ;;  %v499_v54 = vadd.f32 %v793_v36, %v126_v9  ;;  %v823_v27 = vadd.f32 %v1153_v13, %v1151_v11  ;;  %v817_v13 = vadd.f32 %v1145_v3, %v1143_v0  ;;  %v826_v36 = vadd.f32 %v1159_v21, %v1157_v17 }
  0xf9   :  { %v674_v46 = vsel %vm642_vm3, %v580_v34, %v658_v40  ;;  %vm645_vm4 = vcmp.ge.f32.partialorder %v591_v41, 0.0  ;;  %v661_v47 = vmul.f32 0.2, %v591_v41  ;;  %v583_v48 = vadd.f32 %v582_v44, %v486_v43  ;;  %v166_v9 = vpop.permute.xlu0 %165  ;;  %v181_v40 = vpop.permute.xlu1 %180 }
  0xfa   :  { %691 = vst.msk [vmem:[%s1255_s3] sm:$0xff] %vm690_vm1, %v674_v46  ;;  %v797_v49 = vpop.f32.mrf.mxu0  ;;  %v853_v50 = vpop.f32.mrf.mxu1  ;;  %v796_v53 = vadd.f32 %v795_v42, %v794_v37  ;;  %v531_v17 = vadd.f32 %v817_v13, %v166_v9  ;;  %v820_v21 = vadd.f32 %v1149_v8, %v1147_v5 }
  0xfb   :  { %v677_v52 = vsel %vm645_vm4, %v591_v41, %v661_v47  ;;  %vm643_vm5 = vcmp.ge.f32.partialorder %v583_v48, 0.0  ;;  %v659_v55 = vmul.f32 0.2, %v583_v48  ;;  %v542_v47 = vadd.f32 %v826_v36, %v181_v40 }
  0xfc   :  { %694 = vst.msk [vmem:[%s1255_s3 + $0x18] sm:$0xff] %vm690_vm1, %v677_v52  ;;  %v798_v56 = vpop.f32.mrf.mxu0  ;;  %v595_v57 = vpop.f32.mrf.mxu1  ;;  %v502_v4 = vadd.f32 %v796_v53, %v1155_v14  ;;  %v534_v8 = vadd.f32 %v820_v21, %v171_v25 }
  0xfd   :  { %v799_v58 = vadd.f32 %v798_v56, %v797_v49  ;;  %v596_v59 = vadd.f32 %v595_v57, %v499_v54  ;;  %v675_v60 = vsel %vm643_vm5, %v583_v48, %v659_v55  ;;  %v176_v28 = vpop.permute.xlu0 %175 }
  0xfe   :  { %v800_v61 = vpop.f32.mrf.mxu0  ;;  %v854_v62 = vpop.f32.mrf.mxu1  ;;  %692 = vst.msk [vmem:[%s1255_s3 + $0x8] sm:$0xff] %vm690_vm1, %v675_v60  ;;  %v539_v39 = vadd.f32 %v823_v27, %v176_v28 }
  0xff   :  { %v507_v1 = vadd.f32 %v799_v58, %v136_v18  ;;  %vm646_vm6 = vcmp.ge.f32.partialorder %v596_v59, 0.0  ;;  %v662_v2 = vmul.f32 0.2, %v596_v59 }
 0x100   :  { %v801_v6 = vpop.f32.mrf.mxu0  ;;  %v598_v7 = vpop.f32.mrf.mxu1 }
 0x101   :  { %v604_v10 = vadd.f32 %v853_v50, %v507_v1  ;;  %v678_v12 = vsel %vm646_vm6, %v596_v59, %v662_v2  ;;  %v802_v15 = vadd.f32 %v801_v6, %v800_v61  ;;  %v599_v16 = vadd.f32 %v598_v7, %v502_v4 }
 0x102   :  { %695 = vst.msk [vmem:[%s1255_s3 + $0x20] sm:$0xff] %vm690_vm1, %v678_v12  ;;  %v803_v19 = vpop.f32.mrf.mxu0  ;;  %v1192_v20 = vpop.f32.mrf.mxu1 }
 0x103   :  { %vm648_vm7 = vcmp.ge.f32.partialorder %v604_v10, 0.0  ;;  %v664_v18 = vmul.f32 0.2, %v604_v10  ;;  %v510_v22 = vadd.f32 %v802_v15, %v1161_v26  ;;  %vm647_vm8 = vcmp.ge.f32.partialorder %v599_v16, 0.0 }
 0x104   :  { %v663_v14 = vmul.f32 0.2, %v599_v16  ;;  %v804_v23 = vpop.f32.mrf.mxu0  ;;  %v611_v24 = vpop.f32.mrf.mxu1 }
 0x105   :  { %v680_v29 = vsel %vm648_vm7, %v604_v10, %v664_v18  ;;  %v607_v30 = vadd.f32 %v854_v62, %v510_v22  ;;  %v805_v31 = vadd.f32 %v804_v23, %v803_v19 }
 0x106   :  { %697 = vst.msk [vmem:[%s1255_s3 + $0x30] sm:$0xff] %vm690_vm1, %v680_v29  ;;  %v679_v33 = vsel %vm647_vm8, %v599_v16, %v663_v14  ;;  %v806_v34 = vpop.f32.mrf.mxu0  ;;  %v858_v26 = vpop.f32.mrf.mxu1 }
 0x107   :  { %vm649_vm9 = vcmp.ge.f32.partialorder %v607_v30, 0.0  ;;  %v665_v35 = vmul.f32 0.2, %v607_v30  ;;  %696 = vst.msk [vmem:[%s1255_s3 + $0x28] sm:$0xff] %vm690_vm1, %v679_v33  ;;  %v515_v11 = vadd.f32 %v805_v31, %v1163_v32 }
 0x108   :  { %v807_v37 = vpop.f32.mrf.mxu0  ;;  %v614_v38 = vpop.f32.mrf.mxu1 }
 0x109   :  { %v681_v41 = vsel %vm649_vm9, %v607_v30, %v665_v35  ;;  %v612_v42 = vadd.f32 %v611_v24, %v515_v11  ;;  %v808_v43 = vadd.f32 %v807_v37, %v806_v34 }
 0x10a   :  { %698 = vst.msk [vmem:[%s1255_s3 + $0x38] sm:$0xff] %vm690_vm1, %v681_v41  ;;  %v809_v44 = vpop.f32.mrf.mxu0  ;;  %v861_v32 = vpop.f32.mrf.mxu1 }
 0x10b   :  { %vm650_vm10 = vcmp.ge.f32.partialorder %v612_v42, 0.0  ;;  %v666_v46 = vmul.f32 0.2, %v612_v42  ;;  %v518_v0 = vadd.f32 %v808_v43, %v1169_v45  ;;  %v636_v3 = vadd.f32 %v861_v32, %v539_v39 }
 0x10c   :  { %v810_v48 = vpop.f32.mrf.mxu0  ;;  %v627_v49 = vpop.f32.mrf.mxu1 }
 0x10d   :  { %v682_v50 = vsel %vm650_vm10, %v612_v42, %v666_v46  ;;  %v615_v52 = vadd.f32 %v614_v38, %v518_v0  ;;  %vm656_vm11 = vcmp.ge.f32.partialorder %v636_v3, 0.0  ;;  %v672_v53 = vmul.f32 0.2, %v636_v3 }
 0x10e   :  { %699 = vst.msk [vmem:[%s1255_s3 + $0x40] sm:$0xff] %vm690_vm1, %v682_v50  ;;  %v811_v54 = vadd.f32 %v810_v48, %v809_v44  ;;  %v628_v55 = vadd.f32 %v627_v49, %v531_v17  ;;  %v812_v45 = vpop.f32.mrf.mxu0  ;;  %v862_v56 = vpop.f32.mrf.mxu1 }
 0x10f   :  { %vm651_vm12 = vcmp.ge.f32.partialorder %v615_v52, 0.0  ;;  %v667_v57 = vmul.f32 0.2, %v615_v52  ;;  %v688_v58 = vsel %vm656_vm11, %v636_v3, %v672_v53  ;;  %v639_v5 = vadd.f32 %v862_v56, %v542_v47 }
 0x110   :  { %705 = vst.msk [vmem:[%s1255_s3 + $0x70] sm:$0xff] %vm690_vm1, %v688_v58  ;;  %v523_v59 = vadd.f32 %v811_v54, %v1175_v51  ;;  %vm654_vm13 = vcmp.ge.f32.partialorder %v628_v55, 0.0  ;;  %v670_v60 = vmul.f32 0.2, %v628_v55  ;;  %v813_v61 = vpop.f32.mrf.mxu0  ;;  %v630_v62 = vpop.f32.mrf.mxu1 }
 0x111   :  { %v683_v1 = vsel %vm651_vm12, %v615_v52, %v667_v57  ;;  %vm657_vm14 = vcmp.ge.f32.partialorder %v639_v5, 0.0  ;;  %v673_v2 = vmul.f32 0.2, %v639_v5  ;;  %v814_v4 = vadd.f32 %v813_v61, %v812_v45 }
 0x112   :  { %700 = vst.msk [vmem:[%s1255_s3 + $0x48] sm:$0xff] %vm690_vm1, %v683_v1  ;;  %v620_v6 = vadd.f32 %v1192_v20, %v523_v59  ;;  %v686_v7 = vsel %vm654_vm13, %v628_v55, %v670_v60  ;;  %v631_v9 = vadd.f32 %v630_v62, %v534_v8 }
 0x113   :  { %703 = vst.msk [vmem:[%s1255_s3 + $0x60] sm:$0xff] %vm690_vm1, %v686_v7  ;;  %v689_v51 = vsel %vm657_vm14, %v639_v5, %v673_v2  ;;  %v526_v10 = vadd.f32 %v814_v4, %v1181_v63 }
 0x114   :  { %vm652_vm15 = vcmp.ge.f32.partialorder %v620_v6, 0.0  ;;  %v668_v12 = vmul.f32 0.2, %v620_v6  ;;  %706 = vst.msk [vmem:[%s1255_s3 + $0x78] sm:$0xff] %vm690_vm1, %v689_v51  ;;  %vm655_vm0 = vcmp.ge.f32.partialorder %v631_v9, 0.0 }
 0x115   :  { %v671_v15 = vmul.f32 0.2, %v631_v9  ;;  %v623_v16 = vadd.f32 %v858_v26, %v526_v10 }
 0x116   :  { %v684_v19 = vsel %vm652_vm15, %v620_v6, %v668_v12 }
 0x117   :  { %v687_v20 = vsel %vm655_vm0, %v631_v9, %v671_v15  ;;  %701 = vst.msk [vmem:[%s1255_s3 + $0x50] sm:$0xff] %vm690_vm1, %v684_v19  ;;  %vm653_vm2 = vcmp.ge.f32.partialorder %v623_v16, 0.0  ;;  %v669_v18 = vmul.f32 0.2, %v623_v16 }
 0x118   :  { %704 = vst.msk [vmem:[%s1255_s3 + $0x68] sm:$0xff] %vm690_vm1, %v687_v20 }
 0x119   :  { %v685_v63 = vsel %vm653_vm2, %v623_v16, %v669_v18 }
 0x11a   :  { %702 = vst.msk [vmem:[%s1255_s3 + $0x58] sm:$0xff] %vm690_vm1, %v685_v63 }

// kernel: fwd.9
= control target key start
LH: loop header
LB: loop body
LE: loop exit
PB: predicated region body
PF: predicated region fallthrough
CT: control target
= control target key end

     0   :  { %v428_v1 = vmov 0.0   ;;  %vm429_vm0 = vmmov 0   ;;  %v430_v3 = vmov 0   ;;  %v431_v15 = vmov 1983009808   ;;  %s542_s0 = inlined_call_operand.vmem [shape: bf16[1,384,32], index: 0, kind: input, shape index: {}]   ;;  %s543_s1 = inlined_call_operand.vmem [shape: bf16[1,4,384], index: 1, kind: input, shape index: {}]   ;;  %s544_s2 = inlined_call_operand.vmem [shape: f32[1,4,1], index: 2, kind: input, shape index: {}]   ;;  %s545_s3 = inlined_call_operand.vmem [shape: f32[1,4,32], index: 3, kind: output, shape index: {}]  }
   0x1   :  { %v403_v0 = vld [vmem:[%s542_s0 + $0x78] sm:$0xff]   ;;  %378 = vmatprep.subr.bf16.mxu1 %v428_v1  ;;  %394 = vmatprep.mubr.msk.bf16.mxu1 %vm429_vm0, %v428_v1  ;;  %v406_v5 = vld [vmem:[%s542_s0 + $0x70] sm:$0xff]   ;;  %v409_v8 = vld [vmem:[%s542_s0 + $0x68] sm:$0xff]   ;;  %v73_v16 = vunpack.c.l.s4 %v431_v15  ;;  %v75_v17 = vlaneseq  ;;  %vm317_vm1 = vcmask 257024  }
   0x2   :  { %v404_v2 = vld [vmem:[%s542_s0 + $0x38] sm:$0xff]   ;;  %402 = vset.pattern.permute.xlu0 %v430_v3  ;;  %347 = vmatprep.subr.bf16.mxu0 %v403_v0  ;;  %v407_v6 = vld [vmem:[%s542_s0 + $0x30] sm:$0xff]   ;;  %v410_v9 = vld [vmem:[%s542_s0 + $0x28] sm:$0xff]  }
   0x3   :  { %v405_v4 = vld [vmem:[%s542_s0 + $0xb8] sm:$0xff]   ;;  %348 = vmatpush3.bf16.msra.mxu0 %v404_v2  ;;  %v408_v7 = vld [vmem:[%s542_s0 + $0xb0] sm:$0xff]   ;;  %v411_v10 = vld [vmem:[%s542_s0 + $0xa8] sm:$0xff]   ;;  %v74_v21 = vunpack.c.0.s8 %v73_v16  ;;  %v76_v22 = vshrl.u32 %v75_v17, 7 }
   0x4   :  { %379 = vmatpush3.bf16.msra.mxu1 %v405_v4  ;;  %349 = vmatprep.subr.bf16.mxu0 %v406_v5  ;;  %v412_v11 = vld [vmem:[%s542_s0 + $0x60] sm:$0xff]   ;;  %v415_v14 = vld [vmem:[%s542_s0 + $0x58] sm:$0xff]   ;;  %v418_v20 = vld [vmem:[%s542_s0 + $0x50] sm:$0xff]  }
   0x5   :  { %380 = vmatprep.subr.bf16.mxu1 %v428_v1  ;;  %v413_v12 = vld [vmem:[%s542_s0 + $0x20] sm:$0xff]   ;;  %v416_v18 = vld [vmem:[%s542_s0 + $0x18] sm:$0xff]   ;;  %v419_v23 = vld [vmem:[%s542_s0 + $0x10] sm:$0xff]   ;;  %v77_v26 = vsub.s32 %v74_v21, %v76_v22 }
   0x6   :  { %v414_v13 = vld [vmem:[%s542_s0 + $0xa0] sm:$0xff]   ;;  %v417_v19 = vld [vmem:[%s542_s0 + $0x98] sm:$0xff]   ;;  %v420_v24 = vld [vmem:[%s542_s0 + $0x90] sm:$0xff]  }
   0x7   :  { %350 = vmatpush3.bf16.msra.mxu0 %v407_v6  ;;  %v421_v25 = vld [vmem:[%s542_s0 + $0x48] sm:$0xff]   ;;  %v424_v29 = vld [vmem:[%s542_s0 + $0x40] sm:$0xff]  }
   0x8   :  { %381 = vmatpush3.bf16.msra.mxu1 %v408_v7  ;;  %351 = vmatprep.subr.bf16.mxu0 %v409_v8  ;;  %v422_v27 = vld [vmem:[%s542_s0 + $0x8] sm:$0xff]   ;;  %v15_v30 = vld [vmem:[%s543_s1] sm:$0x3f] }
   0x9   :  { %382 = vmatprep.subr.bf16.mxu1 %v428_v1  ;;  %v423_v28 = vld [vmem:[%s542_s0 + $0x88] sm:$0xff]   ;;  %v64_v31 = vld [vmem:[%s544_s2] sm:$0xf]  ;;  %v78_v32 = vrot.slane %v15_v30, %v77_v26  ;;  %v71_v34 = vcombine.high %v15_v30, %v15_v30 }
   0xa   :  { %67 = vperm.xlu0 %402, %v64_v31   ;;  %v425_v33 = vld [vmem:[%s542_s0] sm:$0xff]  }
   0xb   :  { %352 = vmatpush3.bf16.msra.mxu0 %v410_v9  ;;  %v86_v35 = vcombine.high %v78_v32, %v78_v32  ;;  %v426_v36 = vld [vmem:[%s542_s0 + $0x80] sm:$0xff]   ;;  %v85_v37 = vrot.slane %v71_v34, %v77_v26 }
   0xc   :  { %383 = vmatpush3.bf16.msra.mxu1 %v411_v10  ;;  %353 = vmatprep.subr.bf16.mxu0 %v412_v11 }
   0xd   :  { %384 = vmatprep.subr.bf16.mxu1 %v428_v1  ;;  %266 = vmatprep.mubr.bf16.mxu0 %v86_v35 }
   0xf   :  { %354 = vmatpush3.bf16.msra.mxu0 %v413_v12 }
  0x10   :  { %385 = vmatpush3.bf16.msra.mxu1 %v414_v13  ;;  %355 = vmatprep.subr.bf16.mxu0 %v415_v14 }
  0x11   :  { %386 = vmatprep.subr.bf16.mxu1 %v428_v1 }
  0x13   :  { %356 = vmatpush3.bf16.msra.mxu0 %v416_v18 }
  0x14   :  { %387 = vmatpush3.bf16.msra.mxu1 %v417_v19  ;;  %357 = vmatprep.subr.bf16.mxu0 %v418_v20 }
  0x15   :  { %388 = vmatprep.subr.bf16.mxu1 %v428_v1 }
  0x17   :  { %358 = vmatpush3.bf16.msra.mxu0 %v419_v23 }
  0x18   :  { %389 = vmatpush3.bf16.msra.mxu1 %v420_v24  ;;  %359 = vmatprep.subr.bf16.mxu0 %v421_v25 }
  0x19   :  { %390 = vmatprep.subr.bf16.mxu1 %v428_v1 }
  0x1b   :  { %360 = vmatpush3.bf16.msra.mxu0 %v422_v27 }
  0x1c   :  { %391 = vmatpush3.bf16.msra.mxu1 %v423_v28  ;;  %361 = vmatprep.subr.bf16.mxu0 %v424_v29 }
  0x1d   :  { %392 = vmatprep.subr.bf16.mxu1 %v428_v1 }
  0x1f   :  { %362 = vmatpush3.bf16.msra.mxu0 %v425_v33 }
  0x20   :  { %393 = vmatpush3.bf16.msra.mxu1 %v426_v36 }
  0x22   :  { %267 = vmatmul.mubr.bf16.vlgmr.msra.gmra.mxu0 %v78_v32 }
  0x23   :  { %395 = vmatmul.mubr.bf16.vlgmr.msra.gmra.mxu1 %v85_v37 }
  0x85   :  { %v68_v41 = vpop.permute.xlu0 %67 }
  0xe2   :  { %v363_v38 = vpop.f32.mrf.mxu0 }
  0xe3   :  { %v308_v39 = vpop.f32.mrf.mxu1 }
  0xe4   :  { %v364_v40 = vpop.f32.mrf.mxu0 }
  0xe5   :  { %v365_v42 = vadd.f32 %v364_v40, %v363_v38  ;;  %v396_v43 = vpop.f32.mrf.mxu1 }
  0xe6   :  { %v366_v44 = vpop.f32.mrf.mxu0 }
  0xe7   :  { %v269_v45 = vadd.f32 %v365_v42, %v68_v41  ;;  %v311_v46 = vpop.f32.mrf.mxu1 }
  0xe8   :  { %v367_v47 = vpop.f32.mrf.mxu0 }
  0xe9   :  { %v309_v48 = vadd.f32 %v308_v39, %v269_v45  ;;  %v397_v49 = vpop.f32.mrf.mxu1 }
  0xeb   :  { %vm314_vm2 = vcmp.ge.f32.partialorder %v309_v48, 0.0  ;;  %v315_v50 = vmul.f32 0.2, %v309_v48 }
  0xed   :  { %v316_v51 = vsel %vm314_vm2, %v309_v48, %v315_v50 }
  0xee   :  { %318 = vst.msk [vmem:[%s545_s3] sm:$0xf] %vm317_vm1, %v316_v51 }

</bundles_post_ra>
